<compile_context>
chip_gen: v6e
topology: v6e:2x2x1
jax: 0.10.0
libtpu: 0.0.40
codegen_flags: <defaults>
</compile_context>

<pallas_src>
import functools

import jax
import jax.numpy as jnp
from jax import lax
from jax.experimental import pallas as pl
from jax.experimental.pallas import tpu as pltpu  # noqa: F401  (TPU backend)

# ---- configuration (matches VGNN.__init__ at small, shape-consistent sizes).
# NOTE: the reference forward() is only shape-consistent when
# dec_features == enc_features * n_heads, i.e. n_heads == 1 here.
INPUT_FEATURES = 16       # number of graph nodes (codes)
ENC_FEATURES = 32
DEC_FEATURES = 32
N_HEADS = 1
N_LAYERS = 2
ALPHA = 0.2               # LeakyReLU slope
DROPOUT = 0.1             # eval mode -> identity
VARIATIONAL = True
NONE_GRAPH_FEATURES = 0
BATCH = 2

# dot_general dimension numbers: contract the LAST dim of both operands
# ((m,k) x (n,k) -> (m,n)), i.e. "rhs transposed" without an explicit transpose.
_NT_DIMS = (((1,), (1,)), ((), ()))


def _round_up(x, m):
    return ((x + m - 1) // m) * m


# --------------------------------------------------------------------------
# In-kernel helpers (traced Python, fully unrolled: B, H, L are tiny statics)
# --------------------------------------------------------------------------
def _gat_multihead(x_flat, w_list, a_src_list, a_dst_list, row_masks, col_masks,
                   n_nodes, alpha, concat):
    """Multi-head GAT for a batch whose node features are stacked along rows.

    x_flat:      (B*n_nodes, Fin)
    w_list[h]:   (Fin, Fout)
    a_src/dst:   (1, Fout) attention vectors per head
    row_masks:   list of B float (1, n_nodes) node-active masks
    col_masks:   list of B float (n_nodes, 1) node-active masks
    returns:     list of B arrays (n_nodes, Fout*H) if concat else (n_nodes, Fout)
    """
    batch = len(row_masks)
    n_heads = len(w_list)
    per_b = [[] for _ in range(batch)]
    for h in range(n_heads):
        # Batched feature transform: batch folded into the M dim of one matmul.
        wh_flat = jnp.dot(x_flat, w_list[h], preferred_element_type=jnp.float32)
        for b in range(batch):
            wh = wh_flat[b * n_nodes:(b + 1) * n_nodes, :]              # (n, Fout)
            # src scores as a column, dst scores directly as a row (no transpose)
            f_src = lax.dot_general(wh, a_src_list[h], _NT_DIMS,
                                    preferred_element_type=jnp.float32)  # (n, 1)
            f_dst = lax.dot_general(a_dst_list[h], wh, _NT_DIMS,
                                    preferred_element_type=jnp.float32)  # (1, n)
            e = f_src + f_dst                                            # (n, n)
            e = jnp.where(e > 0, e, alpha * e)                           # LeakyReLU
            neigh = jnp.logical_and(col_masks[b] > 0, row_masks[b] > 0)  # (n, n)
            logits = jnp.where(neigh, e, jnp.float32(-1e30))
            m = jnp.max(logits, axis=-1, keepdims=True)
            p = jnp.where(neigh, jnp.exp(logits - m), 0.0)
            denom = jnp.maximum(jnp.sum(p, axis=-1, keepdims=True), 1e-30)
            attn = p * pl.reciprocal(denom, approx=True)
            per_b[b].append(jnp.dot(attn, wh, preferred_element_type=jnp.float32))
    outs = []
    for b in range(batch):
        hs = per_b[b]
        if concat:
            ob = hs[0] if n_heads == 1 else jnp.concatenate(hs, axis=-1)
        else:
            ob = hs[0]
            for extra in hs[1:]:
                ob = ob + extra
            if n_heads > 1:
                ob = ob * (1.0 / n_heads)
        outs.append(ob)
    return outs


# --------------------------------------------------------------------------
# The single fused Pallas kernel
# --------------------------------------------------------------------------
def _vgnn_kernel(*refs, batch, n_nodes, enc_features, dec_features,
                 n_heads, n_layers, alpha, variational):
    B, N = batch, n_nodes
    E, D, H, L = enc_features, dec_features, n_heads, n_layers
    n_dec = _round_up(N + 1, 8)           # decoder node count padded to 8 sublanes
    pad = n_dec - N - 1

    graph_ref, graph_t_ref, embed_ref = refs[0:3]
    enc_refs = refs[3:3 + 3 * L]
    (param_w_ref, param_b_ref,
     dec_w_ref, dec_asrc_ref, dec_adst_ref,
     out_w1_ref, out_b1_ref, out_w2_ref, out_b2_ref,
     pred_ref, kld_ref) = refs[3 + 3 * L:]

    g = graph_ref[...]                    # (B, N)  raw multi-hot values
    gt = graph_t_ref[...]                 # (N, B)  same values, transposed

    # node-active masks (adjacency is the outer product, formed via broadcast)
    rows_enc, cols_enc, sel_cols = [], [], []
    for b in range(B):
        r = g[b:b + 1, :]                 # (1, N)
        c = gt[:, b:b + 1]                # (N, 1)
        rows_enc.append((r != 0).astype(jnp.float32))
        cols_enc.append((c != 0).astype(jnp.float32))
        sel_cols.append((c == 1).astype(jnp.float32))   # KLD selection mask

    embed = embed_ref[...]                # (N+1, E)
    emb_nodes = embed[0:N, :]             # (N, E)
    readout = embed[N:N + 1, :]           # (1, E)   decoder readout node

    # encoder input: same embedding rows for every batch item
    x_flat = jnp.concatenate([emb_nodes] * B, axis=0)          # (B*N, E)

    # ---------------- encoder: L multi-head GAT layers + ELU ----------------
    for l in range(L):
        w_ref = enc_refs[3 * l]           # (H, E, E)
        asrc = enc_refs[3 * l + 1][...]   # (H, E)
        adst = enc_refs[3 * l + 2][...]   # (H, E)
        w_list = [w_ref[h] for h in range(H)]
        asrc_list = [asrc[h:h + 1, :] for h in range(H)]
        adst_list = [adst[h:h + 1, :] for h in range(H)]
        outs = _gat_multihead(x_flat, w_list, asrc_list, adst_list,
                              rows_enc, cols_enc, N, alpha, concat=True)
        x_flat = jnp.concatenate(outs, axis=0)                 # (B*N, E*H)
        x_flat = jnp.where(x_flat > 0, x_flat,
                           jnp.exp(jnp.minimum(x_flat, 0.0)) - 1.0)   # ELU

    # ---------------- variational head + KLD (eval: encoded = mean) --------
    if variational:
        par = (jnp.dot(x_flat, param_w_ref[...],
                       preferred_element_type=jnp.float32) + param_b_ref[...])
        mean = par[:, :D]
        sigma = par[:, D:]
        x_flat = mean                                          # eval reparametrize
        kld_acc = jnp.zeros((1, 1), jnp.float32)
        for b in range(B):
            mean_b = mean[b * N:(b + 1) * N, :]
            sigma_b = sigma[b * N:(b + 1) * N, :]
            term = jnp.exp(sigma_b) - sigma_b - 1.0 + mean_b * mean_b   # (N, D)
            term = term * sel_cols[b]
            s = jnp.sum(jnp.sum(term, axis=-1, keepdims=True),
                        axis=0, keepdims=True)                 # (1, 1)
            n_sel = jnp.sum(sel_cols[b], axis=0, keepdims=True)
            inv = pl.reciprocal(jnp.maximum(n_sel, 1.0), approx=True)
            kld_acc = kld_acc + 0.5 * s * inv
        kld_ref[...] = kld_acc
    else:
        kld_ref[...] = jnp.zeros((1, 1), jnp.float32)

    # ---------------- decoder graph (N nodes + readout, padded to n_dec) ----
    rows_dec, cols_dec, dec_parts = [], [], []
    for b in range(B):
        rows_dec.append(jnp.concatenate(
            [rows_enc[b], jnp.ones((1, 1), jnp.float32),
             jnp.zeros((1, pad), jnp.float32)], axis=1))       # (1, n_dec)
        cols_dec.append(jnp.concatenate(
            [cols_enc[b], jnp.ones((1, 1), jnp.float32),
             jnp.zeros((pad, 1), jnp.float32)], axis=0))       # (n_dec, 1)
        enc_b = x_flat[b * N:(b + 1) * N, :]
        dec_parts.append(jnp.concatenate(
            [enc_b, readout, jnp.zeros((pad, E * H), jnp.float32)], axis=0))
    dec_flat = jnp.concatenate(dec_parts, axis=0)              # (B*n_dec, E*H)

    dec_asrc = dec_asrc_ref[...]          # (H, D)
    dec_adst = dec_adst_ref[...]          # (H, D)
    w_list = [dec_w_ref[h] for h in range(H)]                  # (E*H, D) each
    asrc_list = [dec_asrc[h:h + 1, :] for h in range(H)]
    adst_list = [dec_adst[h:h + 1, :] for h in range(H)]
    dec_outs = _gat_multihead(dec_flat, w_list, asrc_list, adst_list,
                              rows_dec, cols_dec, n_dec, alpha, concat=False)

    last_rows = []
    for b in range(B):
        d = jnp.maximum(dec_outs[b], 0.0)                      # ReLU
        last_rows.append(d[N:N + 1, :])                        # readout node row
    last = jnp.concatenate(last_rows, axis=0)                  # (B, D)

    # ---------------- out_layer: Linear -> ReLU -> Linear -------------------
    hidden = jnp.maximum(
        jnp.dot(last, out_w1_ref[...], preferred_element_type=jnp.float32)
        + out_b1_ref[...], 0.0)
    pred = (jnp.dot(hidden, out_w2_ref[...], preferred_element_type=jnp.float32)
            + out_b2_ref[...])
    pred_ref[...] = pred.astype(pred_ref.dtype)


# --------------------------------------------------------------------------
# Wrapper: one pallas_call, whole-array VMEM blocks, no grid (single launch)
# --------------------------------------------------------------------------
def vgnn_forward(params, data):
    B = data.shape[0]
    N, E, H, D, L = INPUT_FEATURES, ENC_FEATURES, N_HEADS, DEC_FEATURES, N_LAYERS
    graph = data[:, NONE_GRAPH_FEATURES:].astype(jnp.float32)   # (B, N)
    graph_t = graph.T                                           # (N, B)
    # TODO(synk): training-mode 5% random edge dropout, reparametrize noise, and
    # the empty-graph fallback self-loop of data_to_edges are not reproduced
    # (eval path only).

    enc_args = []
    for lp in params["encoder"]:
        enc_args.extend([lp["W"], lp["a_src"], lp["a_dst"]])

    kernel = functools.partial(
        _vgnn_kernel, batch=B, n_nodes=N, enc_features=E, dec_features=D,
        n_heads=H, n_layers=L, alpha=ALPHA, variational=VARIATIONAL)

    pred, kld = pl.pallas_call(
        kernel,
        out_shape=(jax.ShapeDtypeStruct((B, 1), jnp.float32),
                   jax.ShapeDtypeStruct((1, 1), jnp.float32)),
    )(graph, graph_t, params["embed"], *enc_args,
      params["param_W"], params["param_b"].reshape(1, -1),
      params["decoder"]["W"], params["decoder"]["a_src"], params["decoder"]["a_dst"],
      params["out_W1"], params["out_b1"].reshape(1, -1),
      params["out_W2"], params["out_b2"].reshape(1, -1))
    return pred, kld[0, 0]


# --------------------------------------------------------------------------
# Parameters (deterministic synthetic init; shapes from VGNN.__init__)
# --------------------------------------------------------------------------
def init_params(key):
    E, H, D, N = ENC_FEATURES, N_HEADS, DEC_FEATURES, INPUT_FEATURES
    keys = jax.random.split(key, 12)
    p = {}
    embed = 0.1 * jax.random.normal(keys[0], (N + 1, E), jnp.float32)
    p["embed"] = embed.at[0].set(0.0)   # nn.Embedding padding_idx=0 -> zero row
    enc = []
    for l in range(N_LAYERS):
        kw, ka, kb = jax.random.split(keys[1 + l], 3)
        enc.append({
            "W": 0.1 * jax.random.normal(kw, (H, E, E), jnp.float32),
            "a_src": 0.1 * jax.random.normal(ka, (H, E), jnp.float32),
            "a_dst": 0.1 * jax.random.normal(kb, (H, E), jnp.float32),
        })
    p["encoder"] = enc
    kw, ka, kb = jax.random.split(keys[8], 3)
    p["decoder"] = {
        "W": 0.1 * jax.random.normal(kw, (H, E * H, D), jnp.float32),
        "a_src": 0.1 * jax.random.normal(ka, (H, D), jnp.float32),
        "a_dst": 0.1 * jax.random.normal(kb, (H, D), jnp.float32),
    }
    p["param_W"] = 0.1 * jax.random.normal(keys[9], (E * H, 2 * E * H), jnp.float32)
    p["param_b"] = jnp.zeros((2 * E * H,), jnp.float32)
    p["out_W1"] = 0.1 * jax.random.normal(keys[10], (D, D), jnp.float32)
    p["out_b1"] = jnp.zeros((D,), jnp.float32)
    p["out_W2"] = 0.1 * jax.random.normal(keys[11], (D, 1), jnp.float32)
    p["out_b2"] = jnp.zeros((1,), jnp.float32)
    return p


# --------------------------------------------------------------------------
if __name__ == "__main__":
    key = jax.random.PRNGKey(0)
    k_param, k_data = jax.random.split(key)
    params = init_params(k_param)

    # multi-hot binary input, (BATCH, none_graph_features + input_features)
    data = (jax.random.uniform(k_data, (BATCH, NONE_GRAPH_FEATURES + INPUT_FEATURES))
            < 0.4).astype(jnp.int32)
    data = data.at[:, NONE_GRAPH_FEATURES + 1].set(1)   # >=1 active node per item

    prediction, total_kld = jax.jit(vgnn_forward)(params, data)
    jax.block_until_ready(prediction)
    jax.block_until_ready(total_kld)

    assert prediction.shape == (BATCH, 1)
    assert total_kld.shape == ()
    print("KERNEL_OK")
</pallas_src>

<mosaic_0001>
module attributes {stable_mosaic.version = 11 : i64} {
  func.func @_vgnn_kernel(%arg0: memref<2x16xf32, #tpu.memory_space<vmem>>, %arg1: memref<16x2xf32, #tpu.memory_space<vmem>>, %arg2: memref<17x32xf32, #tpu.memory_space<vmem>>, %arg3: memref<1x32x32xf32, #tpu.memory_space<vmem>>, %arg4: memref<1x32xf32, #tpu.memory_space<vmem>>, %arg5: memref<1x32xf32, #tpu.memory_space<vmem>>, %arg6: memref<1x32x32xf32, #tpu.memory_space<vmem>>, %arg7: memref<1x32xf32, #tpu.memory_space<vmem>>, %arg8: memref<1x32xf32, #tpu.memory_space<vmem>>, %arg9: memref<32x64xf32, #tpu.memory_space<vmem>>, %arg10: memref<1x64xf32, #tpu.memory_space<vmem>>, %arg11: memref<1x32x32xf32, #tpu.memory_space<vmem>>, %arg12: memref<1x32xf32, #tpu.memory_space<vmem>>, %arg13: memref<1x32xf32, #tpu.memory_space<vmem>>, %arg14: memref<32x32xf32, #tpu.memory_space<vmem>>, %arg15: memref<1x32xf32, #tpu.memory_space<vmem>>, %arg16: memref<32x1xf32, #tpu.memory_space<vmem>>, %arg17: memref<1x1xf32, #tpu.memory_space<vmem>>, %arg18: memref<2x1xf32, #tpu.memory_space<vmem>>, %arg19: memref<1x1xf32, #tpu.memory_space<vmem>>) attributes {dimension_semantics = [], scalar_prefetch = 0 : i64, scratch_operands = 0 : i64, tpu.core_type = #tpu.core_type<tc>} {
    %c0 = arith.constant 0 : index
    %c0_0 = arith.constant 0 : index
    %0 = vector.load %arg0[%c0, %c0_0] : memref<2x16xf32, #tpu.memory_space<vmem>>, vector<2x16xf32>
    %c0_1 = arith.constant 0 : index
    %c0_2 = arith.constant 0 : index
    %1 = vector.load %arg1[%c0_1, %c0_2] : memref<16x2xf32, #tpu.memory_space<vmem>>, vector<16x2xf32>
    %2 = vector.extract_strided_slice %0 {offsets = [0, 0], sizes = [1, 16], strides = [1, 1]} : vector<2x16xf32> to vector<1x16xf32>
    %3 = vector.extract_strided_slice %1 {offsets = [0, 0], sizes = [16, 1], strides = [1, 1]} : vector<16x2xf32> to vector<16x1xf32>
    %cst = arith.constant 0.000000e+00 : f32
    %4 = vector.broadcast %cst : f32 to vector<1x16xf32>
    %5 = arith.cmpf one, %2, %4 : vector<1x16xf32>
    %6 = arith.extui %5 : vector<1x16xi1> to vector<1x16xi32>
    %7 = arith.sitofp %6 : vector<1x16xi32> to vector<1x16xf32>
    %cst_3 = arith.constant 0.000000e+00 : f32
    %8 = vector.broadcast %cst_3 : f32 to vector<16x1xf32>
    %9 = arith.cmpf one, %3, %8 : vector<16x1xf32>
    %10 = arith.extui %9 : vector<16x1xi1> to vector<16x1xi32>
    %11 = arith.sitofp %10 : vector<16x1xi32> to vector<16x1xf32>
    %cst_4 = arith.constant 1.000000e+00 : f32
    %12 = vector.broadcast %cst_4 : f32 to vector<16x1xf32>
    %13 = arith.cmpf oeq, %3, %12 : vector<16x1xf32>
    %14 = arith.extui %13 : vector<16x1xi1> to vector<16x1xi32>
    %15 = arith.sitofp %14 : vector<16x1xi32> to vector<16x1xf32>
    %16 = vector.extract_strided_slice %0 {offsets = [1, 0], sizes = [1, 16], strides = [1, 1]} : vector<2x16xf32> to vector<1x16xf32>
    %17 = vector.extract_strided_slice %1 {offsets = [0, 1], sizes = [16, 1], strides = [1, 1]} : vector<16x2xf32> to vector<16x1xf32>
    %cst_5 = arith.constant 0.000000e+00 : f32
    %18 = vector.broadcast %cst_5 : f32 to vector<1x16xf32>
    %19 = arith.cmpf one, %16, %18 : vector<1x16xf32>
    %20 = arith.extui %19 : vector<1x16xi1> to vector<1x16xi32>
    %21 = arith.sitofp %20 : vector<1x16xi32> to vector<1x16xf32>
    %cst_6 = arith.constant 0.000000e+00 : f32
    %22 = vector.broadcast %cst_6 : f32 to vector<16x1xf32>
    %23 = arith.cmpf one, %17, %22 : vector<16x1xf32>
    %24 = arith.extui %23 : vector<16x1xi1> to vector<16x1xi32>
    %25 = arith.sitofp %24 : vector<16x1xi32> to vector<16x1xf32>
    %cst_7 = arith.constant 1.000000e+00 : f32
    %26 = vector.broadcast %cst_7 : f32 to vector<16x1xf32>
    %27 = arith.cmpf oeq, %17, %26 : vector<16x1xf32>
    %28 = arith.extui %27 : vector<16x1xi1> to vector<16x1xi32>
    %29 = arith.sitofp %28 : vector<16x1xi32> to vector<16x1xf32>
    %c0_8 = arith.constant 0 : index
    %c0_9 = arith.constant 0 : index
    %30 = vector.load %arg2[%c0_8, %c0_9] : memref<17x32xf32, #tpu.memory_space<vmem>>, vector<17x32xf32>
    %31 = vector.extract_strided_slice %30 {offsets = [0, 0], sizes = [16, 32], strides = [1, 1]} : vector<17x32xf32> to vector<16x32xf32>
    %32 = vector.extract_strided_slice %30 {offsets = [16, 0], sizes = [1, 32], strides = [1, 1]} : vector<17x32xf32> to vector<1x32xf32>
    %33 = tpu.concatenate %31, %31 in 0 : vector<16x32xf32>, vector<16x32xf32> -> vector<32x32xf32>
    %c0_10 = arith.constant 0 : index
    %c0_11 = arith.constant 0 : index
    %34 = vector.load %arg4[%c0_10, %c0_11] : memref<1x32xf32, #tpu.memory_space<vmem>>, vector<1x32xf32>
    %c0_12 = arith.constant 0 : index
    %c0_13 = arith.constant 0 : index
    %35 = vector.load %arg5[%c0_12, %c0_13] : memref<1x32xf32, #tpu.memory_space<vmem>>, vector<1x32xf32>
    %c0_14 = arith.constant 0 : index
    %c0_15 = arith.constant 0 : index
    %c0_16 = arith.constant 0 : index
    %36 = vector.load %arg3[%c0_14, %c0_15, %c0_16] : memref<1x32x32xf32, #tpu.memory_space<vmem>>, vector<1x32x32xf32>
    %37 = vector.shape_cast %36 : vector<1x32x32xf32> to vector<32x32xf32>
    %cst_17 = arith.constant dense<0.000000e+00> : vector<32x32xf32>
    %38 = tpu.matmul %33, %37, %cst_17 {dimension_numbers = #tpu.dot_dimension_numbers<[1], [0], [0], [1], [0, 0, 1, 1], [], []>} : vector<32x32xf32>, vector<32x32xf32>, vector<32x32xf32> -> vector<32x32xf32>
    %39 = vector.extract_strided_slice %38 {offsets = [0, 0], sizes = [16, 32], strides = [1, 1]} : vector<32x32xf32> to vector<16x32xf32>
    %cst_18 = arith.constant dense<0.000000e+00> : vector<16x1xf32>
    %40 = tpu.matmul %39, %34, %cst_18 {dimension_numbers = #tpu.dot_dimension_numbers<[1], [1], [0], [0], [0, 0, 1, 0], [], []>} : vector<16x32xf32>, vector<1x32xf32>, vector<16x1xf32> -> vector<16x1xf32>
    %cst_19 = arith.constant dense<0.000000e+00> : vector<1x16xf32>
    %41 = tpu.matmul %35, %39, %cst_19 {dimension_numbers = #tpu.dot_dimension_numbers<[1], [1], [0], [0], [0, 0, 1, 0], [], []>} : vector<1x32xf32>, vector<16x32xf32>, vector<1x16xf32> -> vector<1x16xf32>
    %42 = vector.broadcast %40 : vector<16x1xf32> to vector<16x16xf32>
    %43 = vector.broadcast %41 : vector<1x16xf32> to vector<16x16xf32>
    %44 = arith.addf %42, %43 : vector<16x16xf32>
    %cst_20 = arith.constant 0.000000e+00 : f32
    %45 = vector.broadcast %cst_20 : f32 to vector<16x16xf32>
    %46 = arith.cmpf ogt, %44, %45 : vector<16x16xf32>
    %cst_21 = arith.constant 2.000000e-01 : f32
    %47 = vector.broadcast %cst_21 : f32 to vector<16x16xf32>
    %48 = arith.mulf %47, %44 : vector<16x16xf32>
    %49 = arith.select %46, %44, %48 : vector<16x16xi1>, vector<16x16xf32>
    %cst_22 = arith.constant 0.000000e+00 : f32
    %50 = vector.broadcast %cst_22 : f32 to vector<16x1xf32>
    %51 = arith.cmpf ogt, %11, %50 : vector<16x1xf32>
    %cst_23 = arith.constant 0.000000e+00 : f32
    %52 = vector.broadcast %cst_23 : f32 to vector<1x16xf32>
    %53 = arith.cmpf ogt, %7, %52 : vector<1x16xf32>
    %54 = vector.broadcast %51 : vector<16x1xi1> to vector<16x16xi1>
    %55 = vector.broadcast %53 : vector<1x16xi1> to vector<16x16xi1>
    %56 = arith.andi %54, %55 : vector<16x16xi1>
    %cst_24 = arith.constant -1.000000e+30 : f32
    %57 = vector.broadcast %cst_24 : f32 to vector<16x16xf32>
    %58 = arith.select %56, %49, %57 : vector<16x16xi1>, vector<16x16xf32>
    %cst_25 = arith.constant dense<0xFF800000> : vector<16xf32>
    %59 = vector.multi_reduction <maximumf>, %58, %cst_25 [1] : vector<16x16xf32> to vector<16xf32>
    %60 = vector.shape_cast %59 : vector<16xf32> to vector<16x1xf32>
    %61 = vector.broadcast %60 : vector<16x1xf32> to vector<16x16xf32>
    %62 = arith.subf %58, %61 : vector<16x16xf32>
    %63 = math.exp %62 : vector<16x16xf32>
    %cst_26 = arith.constant 0.000000e+00 : f32
    %64 = vector.broadcast %cst_26 : f32 to vector<16x16xf32>
    %65 = arith.select %56, %63, %64 : vector<16x16xi1>, vector<16x16xf32>
    %cst_27 = arith.constant dense<0.000000e+00> : vector<16xf32>
    %66 = vector.multi_reduction <add>, %65, %cst_27 [1] : vector<16x16xf32> to vector<16xf32>
    %67 = vector.shape_cast %66 : vector<16xf32> to vector<16x1xf32>
    %cst_28 = arith.constant 1.000000e-30 : f32
    %68 = vector.broadcast %cst_28 : f32 to vector<16x1xf32>
    %69 = arith.maximumf %67, %68 : vector<16x1xf32>
    %70 = tpu.reciprocal %69 {approx = true} : vector<16x1xf32> -> vector<16x1xf32>
    %71 = vector.broadcast %70 : vector<16x1xf32> to vector<16x16xf32>
    %72 = arith.mulf %65, %71 : vector<16x16xf32>
    %cst_29 = arith.constant dense<0.000000e+00> : vector<16x32xf32>
    %73 = tpu.matmul %72, %39, %cst_29 {dimension_numbers = #tpu.dot_dimension_numbers<[1], [0], [0], [1], [0, 0, 1, 1], [], []>} : vector<16x16xf32>, vector<16x32xf32>, vector<16x32xf32> -> vector<16x32xf32>
    %74 = vector.extract_strided_slice %38 {offsets = [16, 0], sizes = [16, 32], strides = [1, 1]} : vector<32x32xf32> to vector<16x32xf32>
    %cst_30 = arith.constant dense<0.000000e+00> : vector<16x1xf32>
    %75 = tpu.matmul %74, %34, %cst_30 {dimension_numbers = #tpu.dot_dimension_numbers<[1], [1], [0], [0], [0, 0, 1, 0], [], []>} : vector<16x32xf32>, vector<1x32xf32>, vector<16x1xf32> -> vector<16x1xf32>
    %cst_31 = arith.constant dense<0.000000e+00> : vector<1x16xf32>
    %76 = tpu.matmul %35, %74, %cst_31 {dimension_numbers = #tpu.dot_dimension_numbers<[1], [1], [0], [0], [0, 0, 1, 0], [], []>} : vector<1x32xf32>, vector<16x32xf32>, vector<1x16xf32> -> vector<1x16xf32>
    %77 = vector.broadcast %75 : vector<16x1xf32> to vector<16x16xf32>
    %78 = vector.broadcast %76 : vector<1x16xf32> to vector<16x16xf32>
    %79 = arith.addf %77, %78 : vector<16x16xf32>
    %cst_32 = arith.constant 0.000000e+00 : f32
    %80 = vector.broadcast %cst_32 : f32 to vector<16x16xf32>
    %81 = arith.cmpf ogt, %79, %80 : vector<16x16xf32>
    %cst_33 = arith.constant 2.000000e-01 : f32
    %82 = vector.broadcast %cst_33 : f32 to vector<16x16xf32>
    %83 = arith.mulf %82, %79 : vector<16x16xf32>
    %84 = arith.select %81, %79, %83 : vector<16x16xi1>, vector<16x16xf32>
    %cst_34 = arith.constant 0.000000e+00 : f32
    %85 = vector.broadcast %cst_34 : f32 to vector<16x1xf32>
    %86 = arith.cmpf ogt, %25, %85 : vector<16x1xf32>
    %cst_35 = arith.constant 0.000000e+00 : f32
    %87 = vector.broadcast %cst_35 : f32 to vector<1x16xf32>
    %88 = arith.cmpf ogt, %21, %87 : vector<1x16xf32>
    %89 = vector.broadcast %86 : vector<16x1xi1> to vector<16x16xi1>
    %90 = vector.broadcast %88 : vector<1x16xi1> to vector<16x16xi1>
    %91 = arith.andi %89, %90 : vector<16x16xi1>
    %cst_36 = arith.constant -1.000000e+30 : f32
    %92 = vector.broadcast %cst_36 : f32 to vector<16x16xf32>
    %93 = arith.select %91, %84, %92 : vector<16x16xi1>, vector<16x16xf32>
    %cst_37 = arith.constant dense<0xFF800000> : vector<16xf32>
    %94 = vector.multi_reduction <maximumf>, %93, %cst_37 [1] : vector<16x16xf32> to vector<16xf32>
    %95 = vector.shape_cast %94 : vector<16xf32> to vector<16x1xf32>
    %96 = vector.broadcast %95 : vector<16x1xf32> to vector<16x16xf32>
    %97 = arith.subf %93, %96 : vector<16x16xf32>
    %98 = math.exp %97 : vector<16x16xf32>
    %cst_38 = arith.constant 0.000000e+00 : f32
    %99 = vector.broadcast %cst_38 : f32 to vector<16x16xf32>
    %100 = arith.select %91, %98, %99 : vector<16x16xi1>, vector<16x16xf32>
    %cst_39 = arith.constant dense<0.000000e+00> : vector<16xf32>
    %101 = vector.multi_reduction <add>, %100, %cst_39 [1] : vector<16x16xf32> to vector<16xf32>
    %102 = vector.shape_cast %101 : vector<16xf32> to vector<16x1xf32>
    %cst_40 = arith.constant 1.000000e-30 : f32
    %103 = vector.broadcast %cst_40 : f32 to vector<16x1xf32>
    %104 = arith.maximumf %102, %103 : vector<16x1xf32>
    %105 = tpu.reciprocal %104 {approx = true} : vector<16x1xf32> -> vector<16x1xf32>
    %106 = vector.broadcast %105 : vector<16x1xf32> to vector<16x16xf32>
    %107 = arith.mulf %100, %106 : vector<16x16xf32>
    %cst_41 = arith.constant dense<0.000000e+00> : vector<16x32xf32>
    %108 = tpu.matmul %107, %74, %cst_41 {dimension_numbers = #tpu.dot_dimension_numbers<[1], [0], [0], [1], [0, 0, 1, 1], [], []>} : vector<16x16xf32>, vector<16x32xf32>, vector<16x32xf32> -> vector<16x32xf32>
    %109 = tpu.concatenate %73, %108 in 0 : vector<16x32xf32>, vector<16x32xf32> -> vector<32x32xf32>
    %cst_42 = arith.constant 0.000000e+00 : f32
    %110 = vector.broadcast %cst_42 : f32 to vector<32x32xf32>
    %111 = arith.cmpf ogt, %109, %110 : vector<32x32xf32>
    %cst_43 = arith.constant 0.000000e+00 : f32
    %112 = vector.broadcast %cst_43 : f32 to vector<32x32xf32>
    %113 = arith.minimumf %109, %112 : vector<32x32xf32>
    %114 = math.exp %113 : vector<32x32xf32>
    %cst_44 = arith.constant 1.000000e+00 : f32
    %115 = vector.broadcast %cst_44 : f32 to vector<32x32xf32>
    %116 = arith.subf %114, %115 : vector<32x32xf32>
    %117 = arith.select %111, %109, %116 : vector<32x32xi1>, vector<32x32xf32>
    %c0_45 = arith.constant 0 : index
    %c0_46 = arith.constant 0 : index
    %118 = vector.load %arg7[%c0_45, %c0_46] : memref<1x32xf32, #tpu.memory_space<vmem>>, vector<1x32xf32>
    %c0_47 = arith.constant 0 : index
    %c0_48 = arith.constant 0 : index
    %119 = vector.load %arg8[%c0_47, %c0_48] : memref<1x32xf32, #tpu.memory_space<vmem>>, vector<1x32xf32>
    %c0_49 = arith.constant 0 : index
    %c0_50 = arith.constant 0 : index
    %c0_51 = arith.constant 0 : index
    %120 = vector.load %arg6[%c0_49, %c0_50, %c0_51] : memref<1x32x32xf32, #tpu.memory_space<vmem>>, vector<1x32x32xf32>
    %121 = vector.shape_cast %120 : vector<1x32x32xf32> to vector<32x32xf32>
    %cst_52 = arith.constant dense<0.000000e+00> : vector<32x32xf32>
    %122 = tpu.matmul %117, %121, %cst_52 {dimension_numbers = #tpu.dot_dimension_numbers<[1], [0], [0], [1], [0, 0, 1, 1], [], []>} : vector<32x32xf32>, vector<32x32xf32>, vector<32x32xf32> -> vector<32x32xf32>
    %123 = vector.extract_strided_slice %122 {offsets = [0, 0], sizes = [16, 32], strides = [1, 1]} : vector<32x32xf32> to vector<16x32xf32>
    %cst_53 = arith.constant dense<0.000000e+00> : vector<16x1xf32>
    %124 = tpu.matmul %123, %118, %cst_53 {dimension_numbers = #tpu.dot_dimension_numbers<[1], [1], [0], [0], [0, 0, 1, 0], [], []>} : vector<16x32xf32>, vector<1x32xf32>, vector<16x1xf32> -> vector<16x1xf32>
    %cst_54 = arith.constant dense<0.000000e+00> : vector<1x16xf32>
    %125 = tpu.matmul %119, %123, %cst_54 {dimension_numbers = #tpu.dot_dimension_numbers<[1], [1], [0], [0], [0, 0, 1, 0], [], []>} : vector<1x32xf32>, vector<16x32xf32>, vector<1x16xf32> -> vector<1x16xf32>
    %126 = vector.broadcast %124 : vector<16x1xf32> to vector<16x16xf32>
    %127 = vector.broadcast %125 : vector<1x16xf32> to vector<16x16xf32>
    %128 = arith.addf %126, %127 : vector<16x16xf32>
    %cst_55 = arith.constant 0.000000e+00 : f32
    %129 = vector.broadcast %cst_55 : f32 to vector<16x16xf32>
    %130 = arith.cmpf ogt, %128, %129 : vector<16x16xf32>
    %cst_56 = arith.constant 2.000000e-01 : f32
    %131 = vector.broadcast %cst_56 : f32 to vector<16x16xf32>
    %132 = arith.mulf %131, %128 : vector<16x16xf32>
    %133 = arith.select %130, %128, %132 : vector<16x16xi1>, vector<16x16xf32>
    %cst_57 = arith.constant 0.000000e+00 : f32
    %134 = vector.broadcast %cst_57 : f32 to vector<16x1xf32>
    %135 = arith.cmpf ogt, %11, %134 : vector<16x1xf32>
    %cst_58 = arith.constant 0.000000e+00 : f32
    %136 = vector.broadcast %cst_58 : f32 to vector<1x16xf32>
    %137 = arith.cmpf ogt, %7, %136 : vector<1x16xf32>
    %138 = vector.broadcast %135 : vector<16x1xi1> to vector<16x16xi1>
    %139 = vector.broadcast %137 : vector<1x16xi1> to vector<16x16xi1>
    %140 = arith.andi %138, %139 : vector<16x16xi1>
    %cst_59 = arith.constant -1.000000e+30 : f32
    %141 = vector.broadcast %cst_59 : f32 to vector<16x16xf32>
    %142 = arith.select %140, %133, %141 : vector<16x16xi1>, vector<16x16xf32>
    %cst_60 = arith.constant dense<0xFF800000> : vector<16xf32>
    %143 = vector.multi_reduction <maximumf>, %142, %cst_60 [1] : vector<16x16xf32> to vector<16xf32>
    %144 = vector.shape_cast %143 : vector<16xf32> to vector<16x1xf32>
    %145 = vector.broadcast %144 : vector<16x1xf32> to vector<16x16xf32>
    %146 = arith.subf %142, %145 : vector<16x16xf32>
    %147 = math.exp %146 : vector<16x16xf32>
    %cst_61 = arith.constant 0.000000e+00 : f32
    %148 = vector.broadcast %cst_61 : f32 to vector<16x16xf32>
    %149 = arith.select %140, %147, %148 : vector<16x16xi1>, vector<16x16xf32>
    %cst_62 = arith.constant dense<0.000000e+00> : vector<16xf32>
    %150 = vector.multi_reduction <add>, %149, %cst_62 [1] : vector<16x16xf32> to vector<16xf32>
    %151 = vector.shape_cast %150 : vector<16xf32> to vector<16x1xf32>
    %cst_63 = arith.constant 1.000000e-30 : f32
    %152 = vector.broadcast %cst_63 : f32 to vector<16x1xf32>
    %153 = arith.maximumf %151, %152 : vector<16x1xf32>
    %154 = tpu.reciprocal %153 {approx = true} : vector<16x1xf32> -> vector<16x1xf32>
    %155 = vector.broadcast %154 : vector<16x1xf32> to vector<16x16xf32>
    %156 = arith.mulf %149, %155 : vector<16x16xf32>
    %cst_64 = arith.constant dense<0.000000e+00> : vector<16x32xf32>
    %157 = tpu.matmul %156, %123, %cst_64 {dimension_numbers = #tpu.dot_dimension_numbers<[1], [0], [0], [1], [0, 0, 1, 1], [], []>} : vector<16x16xf32>, vector<16x32xf32>, vector<16x32xf32> -> vector<16x32xf32>
    %158 = vector.extract_strided_slice %122 {offsets = [16, 0], sizes = [16, 32], strides = [1, 1]} : vector<32x32xf32> to vector<16x32xf32>
    %cst_65 = arith.constant dense<0.000000e+00> : vector<16x1xf32>
    %159 = tpu.matmul %158, %118, %cst_65 {dimension_numbers = #tpu.dot_dimension_numbers<[1], [1], [0], [0], [0, 0, 1, 0], [], []>} : vector<16x32xf32>, vector<1x32xf32>, vector<16x1xf32> -> vector<16x1xf32>
    %cst_66 = arith.constant dense<0.000000e+00> : vector<1x16xf32>
    %160 = tpu.matmul %119, %158, %cst_66 {dimension_numbers = #tpu.dot_dimension_numbers<[1], [1], [0], [0], [0, 0, 1, 0], [], []>} : vector<1x32xf32>, vector<16x32xf32>, vector<1x16xf32> -> vector<1x16xf32>
    %161 = vector.broadcast %159 : vector<16x1xf32> to vector<16x16xf32>
    %162 = vector.broadcast %160 : vector<1x16xf32> to vector<16x16xf32>
    %163 = arith.addf %161, %162 : vector<16x16xf32>
    %cst_67 = arith.constant 0.000000e+00 : f32
    %164 = vector.broadcast %cst_67 : f32 to vector<16x16xf32>
    %165 = arith.cmpf ogt, %163, %164 : vector<16x16xf32>
    %cst_68 = arith.constant 2.000000e-01 : f32
    %166 = vector.broadcast %cst_68 : f32 to vector<16x16xf32>
    %167 = arith.mulf %166, %163 : vector<16x16xf32>
    %168 = arith.select %165, %163, %167 : vector<16x16xi1>, vector<16x16xf32>
    %cst_69 = arith.constant 0.000000e+00 : f32
    %169 = vector.broadcast %cst_69 : f32 to vector<16x1xf32>
    %170 = arith.cmpf ogt, %25, %169 : vector<16x1xf32>
    %cst_70 = arith.constant 0.000000e+00 : f32
    %171 = vector.broadcast %cst_70 : f32 to vector<1x16xf32>
    %172 = arith.cmpf ogt, %21, %171 : vector<1x16xf32>
    %173 = vector.broadcast %170 : vector<16x1xi1> to vector<16x16xi1>
    %174 = vector.broadcast %172 : vector<1x16xi1> to vector<16x16xi1>
    %175 = arith.andi %173, %174 : vector<16x16xi1>
    %cst_71 = arith.constant -1.000000e+30 : f32
    %176 = vector.broadcast %cst_71 : f32 to vector<16x16xf32>
    %177 = arith.select %175, %168, %176 : vector<16x16xi1>, vector<16x16xf32>
    %cst_72 = arith.constant dense<0xFF800000> : vector<16xf32>
    %178 = vector.multi_reduction <maximumf>, %177, %cst_72 [1] : vector<16x16xf32> to vector<16xf32>
    %179 = vector.shape_cast %178 : vector<16xf32> to vector<16x1xf32>
    %180 = vector.broadcast %179 : vector<16x1xf32> to vector<16x16xf32>
    %181 = arith.subf %177, %180 : vector<16x16xf32>
    %182 = math.exp %181 : vector<16x16xf32>
    %cst_73 = arith.constant 0.000000e+00 : f32
    %183 = vector.broadcast %cst_73 : f32 to vector<16x16xf32>
    %184 = arith.select %175, %182, %183 : vector<16x16xi1>, vector<16x16xf32>
    %cst_74 = arith.constant dense<0.000000e+00> : vector<16xf32>
    %185 = vector.multi_reduction <add>, %184, %cst_74 [1] : vector<16x16xf32> to vector<16xf32>
    %186 = vector.shape_cast %185 : vector<16xf32> to vector<16x1xf32>
    %cst_75 = arith.constant 1.000000e-30 : f32
    %187 = vector.broadcast %cst_75 : f32 to vector<16x1xf32>
    %188 = arith.maximumf %186, %187 : vector<16x1xf32>
    %189 = tpu.reciprocal %188 {approx = true} : vector<16x1xf32> -> vector<16x1xf32>
    %190 = vector.broadcast %189 : vector<16x1xf32> to vector<16x16xf32>
    %191 = arith.mulf %184, %190 : vector<16x16xf32>
    %cst_76 = arith.constant dense<0.000000e+00> : vector<16x32xf32>
    %192 = tpu.matmul %191, %158, %cst_76 {dimension_numbers = #tpu.dot_dimension_numbers<[1], [0], [0], [1], [0, 0, 1, 1], [], []>} : vector<16x16xf32>, vector<16x32xf32>, vector<16x32xf32> -> vector<16x32xf32>
    %193 = tpu.concatenate %157, %192 in 0 : vector<16x32xf32>, vector<16x32xf32> -> vector<32x32xf32>
    %cst_77 = arith.constant 0.000000e+00 : f32
    %194 = vector.broadcast %cst_77 : f32 to vector<32x32xf32>
    %195 = arith.cmpf ogt, %193, %194 : vector<32x32xf32>
    %cst_78 = arith.constant 0.000000e+00 : f32
    %196 = vector.broadcast %cst_78 : f32 to vector<32x32xf32>
    %197 = arith.minimumf %193, %196 : vector<32x32xf32>
    %198 = math.exp %197 : vector<32x32xf32>
    %cst_79 = arith.constant 1.000000e+00 : f32
    %199 = vector.broadcast %cst_79 : f32 to vector<32x32xf32>
    %200 = arith.subf %198, %199 : vector<32x32xf32>
    %201 = arith.select %195, %193, %200 : vector<32x32xi1>, vector<32x32xf32>
    %c0_80 = arith.constant 0 : index
    %c0_81 = arith.constant 0 : index
    %202 = vector.load %arg9[%c0_80, %c0_81] : memref<32x64xf32, #tpu.memory_space<vmem>>, vector<32x64xf32>
    %cst_82 = arith.constant dense<0.000000e+00> : vector<32x64xf32>
    %203 = tpu.matmul %201, %202, %cst_82 {dimension_numbers = #tpu.dot_dimension_numbers<[1], [0], [0], [1], [0, 0, 1, 1], [], []>} : vector<32x32xf32>, vector<32x64xf32>, vector<32x64xf32> -> vector<32x64xf32>
    %c0_83 = arith.constant 0 : index
    %c0_84 = arith.constant 0 : index
    %204 = vector.load %arg10[%c0_83, %c0_84] : memref<1x64xf32, #tpu.memory_space<vmem>>, vector<1x64xf32>
    %205 = vector.broadcast %204 : vector<1x64xf32> to vector<32x64xf32>
    %206 = arith.addf %203, %205 : vector<32x64xf32>
    %207 = vector.extract_strided_slice %206 {offsets = [0, 0], sizes = [32, 32], strides = [1, 1]} : vector<32x64xf32> to vector<32x32xf32>
    %208 = vector.extract_strided_slice %206 {offsets = [0, 32], sizes = [32, 32], strides = [1, 1]} : vector<32x64xf32> to vector<32x32xf32>
    %cst_85 = arith.constant 0.000000e+00 : f32
    %209 = vector.broadcast %cst_85 : f32 to vector<1x1xf32>
    %210 = vector.extract_strided_slice %207 {offsets = [0, 0], sizes = [16, 32], strides = [1, 1]} : vector<32x32xf32> to vector<16x32xf32>
    %211 = vector.extract_strided_slice %208 {offsets = [0, 0], sizes = [16, 32], strides = [1, 1]} : vector<32x32xf32> to vector<16x32xf32>
    %212 = math.exp %211 : vector<16x32xf32>
    %213 = arith.subf %212, %211 : vector<16x32xf32>
    %cst_86 = arith.constant 1.000000e+00 : f32
    %214 = vector.broadcast %cst_86 : f32 to vector<16x32xf32>
    %215 = arith.subf %213, %214 : vector<16x32xf32>
    %216 = arith.mulf %210, %210 : vector<16x32xf32>
    %217 = arith.addf %215, %216 : vector<16x32xf32>
    %218 = vector.broadcast %15 : vector<16x1xf32> to vector<16x32xf32>
    %219 = arith.mulf %217, %218 : vector<16x32xf32>
    %cst_87 = arith.constant dense<0.000000e+00> : vector<16xf32>
    %220 = vector.multi_reduction <add>, %219, %cst_87 [1] : vector<16x32xf32> to vector<16xf32>
    %221 = vector.shape_cast %220 : vector<16xf32> to vector<16x1xf32>
    %cst_88 = arith.constant dense<0.000000e+00> : vector<1xf32>
    %222 = vector.multi_reduction <add>, %221, %cst_88 [0] : vector<16x1xf32> to vector<1xf32>
    %223 = vector.shape_cast %222 : vector<1xf32> to vector<1x1xf32>
    %cst_89 = arith.constant dense<0.000000e+00> : vector<1xf32>
    %224 = vector.multi_reduction <add>, %15, %cst_89 [0] : vector<16x1xf32> to vector<1xf32>
    %225 = vector.shape_cast %224 : vector<1xf32> to vector<1x1xf32>
    %cst_90 = arith.constant 1.000000e+00 : f32
    %226 = vector.broadcast %cst_90 : f32 to vector<1x1xf32>
    %227 = arith.maximumf %225, %226 : vector<1x1xf32>
    %228 = tpu.reciprocal %227 {approx = true} : vector<1x1xf32> -> vector<1x1xf32>
    %cst_91 = arith.constant 5.000000e-01 : f32
    %229 = vector.broadcast %cst_91 : f32 to vector<1x1xf32>
    %230 = arith.mulf %229, %223 : vector<1x1xf32>
    %231 = arith.mulf %230, %228 : vector<1x1xf32>
    %232 = arith.addf %209, %231 : vector<1x1xf32>
    %233 = vector.extract_strided_slice %207 {offsets = [16, 0], sizes = [16, 32], strides = [1, 1]} : vector<32x32xf32> to vector<16x32xf32>
    %234 = vector.extract_strided_slice %208 {offsets = [16, 0], sizes = [16, 32], strides = [1, 1]} : vector<32x32xf32> to vector<16x32xf32>
    %235 = math.exp %234 : vector<16x32xf32>
    %236 = arith.subf %235, %234 : vector<16x32xf32>
    %cst_92 = arith.constant 1.000000e+00 : f32
    %237 = vector.broadcast %cst_92 : f32 to vector<16x32xf32>
    %238 = arith.subf %236, %237 : vector<16x32xf32>
    %239 = arith.mulf %233, %233 : vector<16x32xf32>
    %240 = arith.addf %238, %239 : vector<16x32xf32>
    %241 = vector.broadcast %29 : vector<16x1xf32> to vector<16x32xf32>
    %242 = arith.mulf %240, %241 : vector<16x32xf32>
    %cst_93 = arith.constant dense<0.000000e+00> : vector<16xf32>
    %243 = vector.multi_reduction <add>, %242, %cst_93 [1] : vector<16x32xf32> to vector<16xf32>
    %244 = vector.shape_cast %243 : vector<16xf32> to vector<16x1xf32>
    %cst_94 = arith.constant dense<0.000000e+00> : vector<1xf32>
    %245 = vector.multi_reduction <add>, %244, %cst_94 [0] : vector<16x1xf32> to vector<1xf32>
    %246 = vector.shape_cast %245 : vector<1xf32> to vector<1x1xf32>
    %cst_95 = arith.constant dense<0.000000e+00> : vector<1xf32>
    %247 = vector.multi_reduction <add>, %29, %cst_95 [0] : vector<16x1xf32> to vector<1xf32>
    %248 = vector.shape_cast %247 : vector<1xf32> to vector<1x1xf32>
    %cst_96 = arith.constant 1.000000e+00 : f32
    %249 = vector.broadcast %cst_96 : f32 to vector<1x1xf32>
    %250 = arith.maximumf %248, %249 : vector<1x1xf32>
    %251 = tpu.reciprocal %250 {approx = true} : vector<1x1xf32> -> vector<1x1xf32>
    %cst_97 = arith.constant 5.000000e-01 : f32
    %252 = vector.broadcast %cst_97 : f32 to vector<1x1xf32>
    %253 = arith.mulf %252, %246 : vector<1x1xf32>
    %254 = arith.mulf %253, %251 : vector<1x1xf32>
    %255 = arith.addf %232, %254 : vector<1x1xf32>
    %c0_98 = arith.constant 0 : index
    %c0_99 = arith.constant 0 : index
    %256 = vector.load %arg19[%c0_98, %c0_99] : memref<1x1xf32, #tpu.memory_space<vmem>>, vector<1x1xf32>
    tpu.vector_store %arg19[%c0_98, %c0_99], %255 {strides = array<i32>} : memref<1x1xf32, #tpu.memory_space<vmem>>, vector<1x1xf32>,
    %cst_100 = arith.constant 1.000000e+00 : f32
    %257 = vector.broadcast %cst_100 : f32 to vector<1x1xf32>
    %cst_101 = arith.constant 0.000000e+00 : f32
    %258 = vector.broadcast %cst_101 : f32 to vector<1x7xf32>
    %259 = tpu.concatenate %7, %257, %258 in 1 : vector<1x16xf32>, vector<1x1xf32>, vector<1x7xf32> -> vector<1x24xf32>
    %cst_102 = arith.constant 1.000000e+00 : f32
    %260 = vector.broadcast %cst_102 : f32 to vector<1x1xf32>
    %cst_103 = arith.constant 0.000000e+00 : f32
    %261 = vector.broadcast %cst_103 : f32 to vector<7x1xf32>
    %262 = tpu.concatenate %11, %260, %261 in 0 : vector<16x1xf32>, vector<1x1xf32>, vector<7x1xf32> -> vector<24x1xf32>
    %263 = vector.extract_strided_slice %207 {offsets = [0, 0], sizes = [16, 32], strides = [1, 1]} : vector<32x32xf32> to vector<16x32xf32>
    %cst_104 = arith.constant 0.000000e+00 : f32
    %264 = vector.broadcast %cst_104 : f32 to vector<7x32xf32>
    %265 = tpu.concatenate %263, %32, %264 in 0 : vector<16x32xf32>, vector<1x32xf32>, vector<7x32xf32> -> vector<24x32xf32>
    %cst_105 = arith.constant 1.000000e+00 : f32
    %266 = vector.broadcast %cst_105 : f32 to vector<1x1xf32>
    %cst_106 = arith.constant 0.000000e+00 : f32
    %267 = vector.broadcast %cst_106 : f32 to vector<1x7xf32>
    %268 = tpu.concatenate %21, %266, %267 in 1 : vector<1x16xf32>, vector<1x1xf32>, vector<1x7xf32> -> vector<1x24xf32>
    %cst_107 = arith.constant 1.000000e+00 : f32
    %269 = vector.broadcast %cst_107 : f32 to vector<1x1xf32>
    %cst_108 = arith.constant 0.000000e+00 : f32
    %270 = vector.broadcast %cst_108 : f32 to vector<7x1xf32>
    %271 = tpu.concatenate %25, %269, %270 in 0 : vector<16x1xf32>, vector<1x1xf32>, vector<7x1xf32> -> vector<24x1xf32>
    %272 = vector.extract_strided_slice %207 {offsets = [16, 0], sizes = [16, 32], strides = [1, 1]} : vector<32x32xf32> to vector<16x32xf32>
    %cst_109 = arith.constant 0.000000e+00 : f32
    %273 = vector.broadcast %cst_109 : f32 to vector<7x32xf32>
    %274 = tpu.concatenate %272, %32, %273 in 0 : vector<16x32xf32>, vector<1x32xf32>, vector<7x32xf32> -> vector<24x32xf32>
    %275 = tpu.concatenate %265, %274 in 0 : vector<24x32xf32>, vector<24x32xf32> -> vector<48x32xf32>
    %c0_110 = arith.constant 0 : index
    %c0_111 = arith.constant 0 : index
    %276 = vector.load %arg12[%c0_110, %c0_111] : memref<1x32xf32, #tpu.memory_space<vmem>>, vector<1x32xf32>
    %c0_112 = arith.constant 0 : index
    %c0_113 = arith.constant 0 : index
    %277 = vector.load %arg13[%c0_112, %c0_113] : memref<1x32xf32, #tpu.memory_space<vmem>>, vector<1x32xf32>
    %c0_114 = arith.constant 0 : index
    %c0_115 = arith.constant 0 : index
    %c0_116 = arith.constant 0 : index
    %278 = vector.load %arg11[%c0_114, %c0_115, %c0_116] : memref<1x32x32xf32, #tpu.memory_space<vmem>>, vector<1x32x32xf32>
    %279 = vector.shape_cast %278 : vector<1x32x32xf32> to vector<32x32xf32>
    %cst_117 = arith.constant dense<0.000000e+00> : vector<48x32xf32>
    %280 = tpu.matmul %275, %279, %cst_117 {dimension_numbers = #tpu.dot_dimension_numbers<[1], [0], [0], [1], [0, 0, 1, 1], [], []>} : vector<48x32xf32>, vector<32x32xf32>, vector<48x32xf32> -> vector<48x32xf32>
    %281 = vector.extract_strided_slice %280 {offsets = [0, 0], sizes = [24, 32], strides = [1, 1]} : vector<48x32xf32> to vector<24x32xf32>
    %cst_118 = arith.constant dense<0.000000e+00> : vector<24x1xf32>
    %282 = tpu.matmul %281, %276, %cst_118 {dimension_numbers = #tpu.dot_dimension_numbers<[1], [1], [0], [0], [0, 0, 1, 0], [], []>} : vector<24x32xf32>, vector<1x32xf32>, vector<24x1xf32> -> vector<24x1xf32>
    %cst_119 = arith.constant dense<0.000000e+00> : vector<1x24xf32>
    %283 = tpu.matmul %277, %281, %cst_119 {dimension_numbers = #tpu.dot_dimension_numbers<[1], [1], [0], [0], [0, 0, 1, 0], [], []>} : vector<1x32xf32>, vector<24x32xf32>, vector<1x24xf32> -> vector<1x24xf32>
    %284 = vector.broadcast %282 : vector<24x1xf32> to vector<24x24xf32>
    %285 = vector.broadcast %283 : vector<1x24xf32> to vector<24x24xf32>
    %286 = arith.addf %284, %285 : vector<24x24xf32>
    %cst_120 = arith.constant 0.000000e+00 : f32
    %287 = vector.broadcast %cst_120 : f32 to vector<24x24xf32>
    %288 = arith.cmpf ogt, %286, %287 : vector<24x24xf32>
    %cst_121 = arith.constant 2.000000e-01 : f32
    %289 = vector.broadcast %cst_121 : f32 to vector<24x24xf32>
    %290 = arith.mulf %289, %286 : vector<24x24xf32>
    %291 = arith.select %288, %286, %290 : vector<24x24xi1>, vector<24x24xf32>
    %cst_122 = arith.constant 0.000000e+00 : f32
    %292 = vector.broadcast %cst_122 : f32 to vector<24x1xf32>
    %293 = arith.cmpf ogt, %262, %292 : vector<24x1xf32>
    %cst_123 = arith.constant 0.000000e+00 : f32
    %294 = vector.broadcast %cst_123 : f32 to vector<1x24xf32>
    %295 = arith.cmpf ogt, %259, %294 : vector<1x24xf32>
    %296 = vector.broadcast %293 : vector<24x1xi1> to vector<24x24xi1>
    %297 = vector.broadcast %295 : vector<1x24xi1> to vector<24x24xi1>
    %298 = arith.andi %296, %297 : vector<24x24xi1>
    %cst_124 = arith.constant -1.000000e+30 : f32
    %299 = vector.broadcast %cst_124 : f32 to vector<24x24xf32>
    %300 = arith.select %298, %291, %299 : vector<24x24xi1>, vector<24x24xf32>
    %cst_125 = arith.constant dense<0xFF800000> : vector<24xf32>
    %301 = vector.multi_reduction <maximumf>, %300, %cst_125 [1] : vector<24x24xf32> to vector<24xf32>
    %302 = vector.shape_cast %301 : vector<24xf32> to vector<24x1xf32>
    %303 = vector.broadcast %302 : vector<24x1xf32> to vector<24x24xf32>
    %304 = arith.subf %300, %303 : vector<24x24xf32>
    %305 = math.exp %304 : vector<24x24xf32>
    %cst_126 = arith.constant 0.000000e+00 : f32
    %306 = vector.broadcast %cst_126 : f32 to vector<24x24xf32>
    %307 = arith.select %298, %305, %306 : vector<24x24xi1>, vector<24x24xf32>
    %cst_127 = arith.constant dense<0.000000e+00> : vector<24xf32>
    %308 = vector.multi_reduction <add>, %307, %cst_127 [1] : vector<24x24xf32> to vector<24xf32>
    %309 = vector.shape_cast %308 : vector<24xf32> to vector<24x1xf32>
    %cst_128 = arith.constant 1.000000e-30 : f32
    %310 = vector.broadcast %cst_128 : f32 to vector<24x1xf32>
    %311 = arith.maximumf %309, %310 : vector<24x1xf32>
    %312 = tpu.reciprocal %311 {approx = true} : vector<24x1xf32> -> vector<24x1xf32>
    %313 = vector.broadcast %312 : vector<24x1xf32> to vector<24x24xf32>
    %314 = arith.mulf %307, %313 : vector<24x24xf32>
    %cst_129 = arith.constant dense<0.000000e+00> : vector<24x32xf32>
    %315 = tpu.matmul %314, %281, %cst_129 {dimension_numbers = #tpu.dot_dimension_numbers<[1], [0], [0], [1], [0, 0, 1, 1], [], []>} : vector<24x24xf32>, vector<24x32xf32>, vector<24x32xf32> -> vector<24x32xf32>
    %316 = vector.extract_strided_slice %280 {offsets = [24, 0], sizes = [24, 32], strides = [1, 1]} : vector<48x32xf32> to vector<24x32xf32>
    %cst_130 = arith.constant dense<0.000000e+00> : vector<24x1xf32>
    %317 = tpu.matmul %316, %276, %cst_130 {dimension_numbers = #tpu.dot_dimension_numbers<[1], [1], [0], [0], [0, 0, 1, 0], [], []>} : vector<24x32xf32>, vector<1x32xf32>, vector<24x1xf32> -> vector<24x1xf32>
    %cst_131 = arith.constant dense<0.000000e+00> : vector<1x24xf32>
    %318 = tpu.matmul %277, %316, %cst_131 {dimension_numbers = #tpu.dot_dimension_numbers<[1], [1], [0], [0], [0, 0, 1, 0], [], []>} : vector<1x32xf32>, vector<24x32xf32>, vector<1x24xf32> -> vector<1x24xf32>
    %319 = vector.broadcast %317 : vector<24x1xf32> to vector<24x24xf32>
    %320 = vector.broadcast %318 : vector<1x24xf32> to vector<24x24xf32>
    %321 = arith.addf %319, %320 : vector<24x24xf32>
    %cst_132 = arith.constant 0.000000e+00 : f32
    %322 = vector.broadcast %cst_132 : f32 to vector<24x24xf32>
    %323 = arith.cmpf ogt, %321, %322 : vector<24x24xf32>
    %cst_133 = arith.constant 2.000000e-01 : f32
    %324 = vector.broadcast %cst_133 : f32 to vector<24x24xf32>
    %325 = arith.mulf %324, %321 : vector<24x24xf32>
    %326 = arith.select %323, %321, %325 : vector<24x24xi1>, vector<24x24xf32>
    %cst_134 = arith.constant 0.000000e+00 : f32
    %327 = vector.broadcast %cst_134 : f32 to vector<24x1xf32>
    %328 = arith.cmpf ogt, %271, %327 : vector<24x1xf32>
    %cst_135 = arith.constant 0.000000e+00 : f32
    %329 = vector.broadcast %cst_135 : f32 to vector<1x24xf32>
    %330 = arith.cmpf ogt, %268, %329 : vector<1x24xf32>
    %331 = vector.broadcast %328 : vector<24x1xi1> to vector<24x24xi1>
    %332 = vector.broadcast %330 : vector<1x24xi1> to vector<24x24xi1>
    %333 = arith.andi %331, %332 : vector<24x24xi1>
    %cst_136 = arith.constant -1.000000e+30 : f32
    %334 = vector.broadcast %cst_136 : f32 to vector<24x24xf32>
    %335 = arith.select %333, %326, %334 : vector<24x24xi1>, vector<24x24xf32>
    %cst_137 = arith.constant dense<0xFF800000> : vector<24xf32>
    %336 = vector.multi_reduction <maximumf>, %335, %cst_137 [1] : vector<24x24xf32> to vector<24xf32>
    %337 = vector.shape_cast %336 : vector<24xf32> to vector<24x1xf32>
    %338 = vector.broadcast %337 : vector<24x1xf32> to vector<24x24xf32>
    %339 = arith.subf %335, %338 : vector<24x24xf32>
    %340 = math.exp %339 : vector<24x24xf32>
    %cst_138 = arith.constant 0.000000e+00 : f32
    %341 = vector.broadcast %cst_138 : f32 to vector<24x24xf32>
    %342 = arith.select %333, %340, %341 : vector<24x24xi1>, vector<24x24xf32>
    %cst_139 = arith.constant dense<0.000000e+00> : vector<24xf32>
    %343 = vector.multi_reduction <add>, %342, %cst_139 [1] : vector<24x24xf32> to vector<24xf32>
    %344 = vector.shape_cast %343 : vector<24xf32> to vector<24x1xf32>
    %cst_140 = arith.constant 1.000000e-30 : f32
    %345 = vector.broadcast %cst_140 : f32 to vector<24x1xf32>
    %346 = arith.maximumf %344, %345 : vector<24x1xf32>
    %347 = tpu.reciprocal %346 {approx = true} : vector<24x1xf32> -> vector<24x1xf32>
    %348 = vector.broadcast %347 : vector<24x1xf32> to vector<24x24xf32>
    %349 = arith.mulf %342, %348 : vector<24x24xf32>
    %cst_141 = arith.constant dense<0.000000e+00> : vector<24x32xf32>
    %350 = tpu.matmul %349, %316, %cst_141 {dimension_numbers = #tpu.dot_dimension_numbers<[1], [0], [0], [1], [0, 0, 1, 1], [], []>} : vector<24x24xf32>, vector<24x32xf32>, vector<24x32xf32> -> vector<24x32xf32>
    %cst_142 = arith.constant 0.000000e+00 : f32
    %351 = vector.broadcast %cst_142 : f32 to vector<24x32xf32>
    %352 = arith.maximumf %315, %351 : vector<24x32xf32>
    %353 = vector.extract_strided_slice %352 {offsets = [16, 0], sizes = [1, 32], strides = [1, 1]} : vector<24x32xf32> to vector<1x32xf32>
    %cst_143 = arith.constant 0.000000e+00 : f32
    %354 = vector.broadcast %cst_143 : f32 to vector<24x32xf32>
    %355 = arith.maximumf %350, %354 : vector<24x32xf32>
    %356 = vector.extract_strided_slice %355 {offsets = [16, 0], sizes = [1, 32], strides = [1, 1]} : vector<24x32xf32> to vector<1x32xf32>
    %357 = tpu.concatenate %353, %356 in 0 : vector<1x32xf32>, vector<1x32xf32> -> vector<2x32xf32>
    %c0_144 = arith.constant 0 : index
    %c0_145 = arith.constant 0 : index
    %358 = vector.load %arg14[%c0_144, %c0_145] : memref<32x32xf32, #tpu.memory_space<vmem>>, vector<32x32xf32>
    %cst_146 = arith.constant dense<0.000000e+00> : vector<2x32xf32>
    %359 = tpu.matmul %357, %358, %cst_146 {dimension_numbers = #tpu.dot_dimension_numbers<[1], [0], [0], [1], [0, 0, 1, 1], [], []>} : vector<2x32xf32>, vector<32x32xf32>, vector<2x32xf32> -> vector<2x32xf32>
    %c0_147 = arith.constant 0 : index
    %c0_148 = arith.constant 0 : index
    %360 = vector.load %arg15[%c0_147, %c0_148] : memref<1x32xf32, #tpu.memory_space<vmem>>, vector<1x32xf32>
    %361 = vector.broadcast %360 : vector<1x32xf32> to vector<2x32xf32>
    %362 = arith.addf %359, %361 : vector<2x32xf32>
    %cst_149 = arith.constant 0.000000e+00 : f32
    %363 = vector.broadcast %cst_149 : f32 to vector<2x32xf32>
    %364 = arith.maximumf %362, %363 : vector<2x32xf32>
    %c0_150 = arith.constant 0 : index
    %c0_151 = arith.constant 0 : index
    %365 = vector.load %arg16[%c0_150, %c0_151] : memref<32x1xf32, #tpu.memory_space<vmem>>, vector<32x1xf32>
    %cst_152 = arith.constant dense<0.000000e+00> : vector<2x1xf32>
    %366 = tpu.matmul %364, %365, %cst_152 {dimension_numbers = #tpu.dot_dimension_numbers<[1], [0], [0], [1], [0, 0, 1, 1], [], []>} : vector<2x32xf32>, vector<32x1xf32>, vector<2x1xf32> -> vector<2x1xf32>
    %c0_153 = arith.constant 0 : index
    %c0_154 = arith.constant 0 : index
    %367 = vector.load %arg17[%c0_153, %c0_154] : memref<1x1xf32, #tpu.memory_space<vmem>>, vector<1x1xf32>
    %368 = vector.broadcast %367 : vector<1x1xf32> to vector<2x1xf32>
    %369 = arith.addf %366, %368 : vector<2x1xf32>
    %c0_155 = arith.constant 0 : index
    %c0_156 = arith.constant 0 : index
    %370 = vector.load %arg18[%c0_155, %c0_156] : memref<2x1xf32, #tpu.memory_space<vmem>>, vector<2x1xf32>
    tpu.vector_store %arg18[%c0_155, %c0_156], %369 {strides = array<i32>} : memref<2x1xf32, #tpu.memory_space<vmem>>, vector<2x1xf32>,
    return
  }
}

</mosaic_0001>

<bundles_post_ra>
// kernel: vgnn_forward.1
= control target key start
LH: loop header
LB: loop body
LE: loop exit
PB: predicated region body
PF: predicated region fallthrough
CT: control target
= control target key end

     0   :  { %s3644_s0 = inlined_call_operand.vmem [shape: f32[2,16], index: 0, kind: input, shape index: {}]   ;;  %s3645_s1 = inlined_call_operand.vmem [shape: f32[16,2], index: 1, kind: input, shape index: {}]   ;;  %s3646_s2 = inlined_call_operand.hbm [shape: f32[17,32], index: 2, kind: input, shape index: {}]   ;;  %s3647_s3 = inlined_call_operand.vmem [shape: f32[1,32,32], index: 3, kind: input, shape index: {}]   ;;  %s3648_s4 = inlined_call_operand.vmem [shape: f32[1,32], index: 4, kind: input, shape index: {}]   ;;  %s3649_s5 = inlined_call_operand.vmem [shape: f32[1,32], index: 5, kind: input, shape index: {}]   ;;  %s3650_s6 = inlined_call_operand.vmem [shape: f32[1,32,32], index: 6, kind: input, shape index: {}]   ;;  %s3651_s7 = inlined_call_operand.vmem [shape: f32[1,32], index: 7, kind: input, shape index: {}]   ;;  %s3652_s8 = inlined_call_operand.vmem [shape: f32[1,32], index: 8, kind: input, shape index: {}]   ;;  %s3653_s9 = inlined_call_operand.hbm [shape: f32[32,64], index: 9, kind: input, shape index: {}]   ;;  %s3654_s10 = inlined_call_operand.vmem [shape: f32[1,64], index: 10, kind: input, shape index: {}]   ;;  %s3655_s11 = inlined_call_operand.hbm [shape: f32[1,32,32], index: 11, kind: input, shape index: {}]   ;;  %s3656_s12 = inlined_call_operand.hbm [shape: f32[1,32], index: 12, kind: input, shape index: {}]   ;;  %s3657_s13 = inlined_call_operand.hbm [shape: f32[1,32], index: 13, kind: input, shape index: {}]   ;;  %s3658_s14 = inlined_call_operand.hbm [shape: f32[32,32], index: 14, kind: input, shape index: {}]   ;;  %s3659_s15 = inlined_call_operand.vmem [shape: f32[1,32], index: 15, kind: input, shape index: {}]   ;;  %s3660_s16 = inlined_call_operand.vmem [shape: f32[32,1], index: 16, kind: input, shape index: {}]   ;;  %s3661_s17 = inlined_call_operand.<no memory space> [shape: f32[1,1], index: 17, kind: input, shape index: {}]   ;;  %s3662_s18 = inlined_call_operand.vmem [shape: f32[2,1], index: 18, kind: output, shape index: {0}]   ;;  %s3663_s19 = inlined_call_operand.hbm [shape: f32[1,1], index: 19, kind: output, shape index: {1}]  }
   0x1   :  { %3673 = sst [smem:[#allocation20_spill]] %s3644_s0  ;;  %v25_v0 = vstv %s3661_s17 }
   0x2   :  { %3674 = sst [smem:[#allocation21_spill]] %s3645_s1  ;;  %26 = vst [vmem:[#allocation2] sm:$0x1] %v25_v0 }
   0x3   :  { %3675 = sst [smem:[#allocation22_spill]] %s3646_s2 }
   0x4   :  { %3676 = sst [smem:[#allocation23_spill]] %s3647_s3 }
   0x5   :  { %27 = vsyncpa [#allocation4], 0 }
   0x6   :  { %28 = vsyncpa [#allocation7], 0 }
   0x7   :  { %29 = vsyncpa [#allocation10], 0 }
   0x8   :  { %30 = vsyncpa [#allocation13], 0 }
   0x9   :  { %31 = vsyncpa [#allocation5], 0  ;;  %s2989_s20 = smov [#allocation6]   ;;  %s2990_s1 = smov [#allocation9]  }
   0xa   :  { %s65_s21 = sshll.u32 %s2989_s20, 4  ;;  %s92_s22 = sshll.u32 %s2990_s1, 4  ;;  %s66_s21 = int_to_ptr.vmem [resolvable:$true] %s65_s21  ;;  %s93_s22 = int_to_ptr.vmem [resolvable:$true] %s92_s22 }
   0xb   :  { %s2847_s2 = scalar_lea.vmem %s66_s21, 512  ;;  %p2852_p1 = scmp.lt.s32.totalorder %s66_s21, %s66_s21 }
   0xc   :  { %p2848_p0 = scmp.ne.s32.totalorder %s66_s21, %s2847_s2  ;;  %p2853_p2 = scmp.lt.s32.totalorder %s2847_s2, %s2847_s2 }
   0xe   :  { %p2854_p3 = por %p2853_p2, %p2852_p1 }
  0x10   :  { %p2855_p4 = pnand %p2854_p3, %p2848_p0 }
  0x12   :  { %2858 = shalt.err (!%p2855_p4)
}
  0x13   :  { %s2991_s17 = smov 128   ;;  %s2992_s23 = smov 8  }
  0x14   :  { %71 = dma.hbm_to_vmem [thread:$0]  %s3653_s9, 512, %s66_s21, [#allocation7], %s2991_s17, %s2991_s17, %s2992_s23  }
  0x15   :  { %s2867_s3 = scalar_lea.vmem %s93_s22, 16  ;;  %s2871_s26 = scalar_lea.vmem %s93_s22, 32 }
  0x16   :  { %p2868_p5 = scmp.ne.s32.totalorder %s93_s22, %s2867_s3  ;;  %p2872_p6 = scmp.lt.s32.totalorder %s93_s22, %s93_s22 }
  0x17   :  { %p2873_p7 = scmp.lt.s32.totalorder %s2871_s26, %s2867_s3 }
  0x19   :  { %p2874_p8 = por %p2873_p7, %p2872_p6 }
  0x1b   :  { %p2875_p9 = pnand %p2874_p8, %p2868_p5 }
  0x1d   :  { %2878 = shalt.err (!%p2875_p9)
}
  0x1e   :  { %95 = dma.hbm_to_vmem [thread:$0]  %s3656_s12, 16, %s93_s22, [#allocation10]  }
  0x1f   :  { %s2993_s29 = smov [#allocation3]   ;;  %s2994_s30 = smov [#allocation8]  }
  0x20   :  { %s41_s0 = sshll.u32 %s2993_s29, 4  ;;  %s79_s20 = sshll.u32 %s2994_s30, 4  ;;  %s42_s0 = int_to_ptr.vmem [resolvable:$true] %s41_s0  ;;  %s80_s20 = int_to_ptr.vmem [resolvable:$true] %s79_s20 }
  0x21   :  { %s2887_s1 = scalar_lea.vmem %s42_s0, 384  ;;  %p2892_p11 = scmp.lt.s32.totalorder %s42_s0, %s42_s0 }
  0x22   :  { %p2888_p10 = scmp.ne.s32.totalorder %s42_s0, %s2887_s1  ;;  %p2893_p12 = scmp.lt.s32.totalorder %s2887_s1, %s2887_s1 }
  0x24   :  { %p2894_p13 = por %p2893_p12, %p2892_p11 }
  0x26   :  { %p2895_p0 = pnand %p2894_p13, %p2888_p10 }
  0x28   :  { %2898 = shalt.err (!%p2895_p0)
}
  0x29   :  { %s3677_s2 = sld [smem:[#allocation22_spill]]  ;;  %s2907_s12 = scalar_lea.vmem %s80_s20, 512 }
  0x2a   :  { %p2908_p1 = scmp.ne.s32.totalorder %s80_s20, %s2907_s12  ;;  %p2912_p2 = scmp.lt.s32.totalorder %s80_s20, %s80_s20 }
  0x2b   :  { %p2913_p3 = scmp.lt.s32.totalorder %s2907_s12, %s2907_s12 }
  0x2d   :  { %p2914_p4 = por %p2913_p3, %p2912_p2 }
  0x2f   :  { %47 = dma.hbm_to_vmem [thread:$0]  %s3677_s2, 384, %s42_s0, [#allocation4], %s2991_s17, %s2991_s17, %s2992_s23  }
  0x30   :  { %p2915_p5 = pnand %p2914_p4, %p2908_p1 }
  0x32   :  { %2918 = shalt.err (!%p2915_p5)
}
  0x33   :  { %85 = dma.hbm_to_vmem [thread:$0]  %s3655_s11, 512, %s80_s20, [#allocation7], %s2991_s17, %s2991_s17, %s2992_s23  }
  0x34   :  { %s2995_s25 = smov [#allocation11]   ;;  %s2996_s26 = smov [#allocation12]  }
  0x35   :  { %s102_s3 = sshll.u32 %s2995_s25, 4  ;;  %s111_s27 = sshll.u32 %s2996_s26, 4  ;;  %s103_s3 = int_to_ptr.vmem [resolvable:$true] %s102_s3  ;;  %s112_s27 = int_to_ptr.vmem [resolvable:$true] %s111_s27 }
  0x36   :  { %s2927_s28 = scalar_lea.vmem %s103_s3, 16  ;;  %s2931_s29 = scalar_lea.vmem %s103_s3, 32 }
  0x37   :  { %p2928_p6 = scmp.ne.s32.totalorder %s103_s3, %s2927_s28  ;;  %p2932_p7 = scmp.lt.s32.totalorder %s103_s3, %s103_s3 }
  0x38   :  { %p2933_p8 = scmp.lt.s32.totalorder %s2931_s29, %s2927_s28 }
  0x3a   :  { %p2934_p9 = por %p2933_p8, %p2932_p7 }
  0x3c   :  { %p2935_p10 = pnand %p2934_p9, %p2928_p6 }
  0x3e   :  { %2938 = shalt.err (!%p2935_p10)
}
  0x3f   :  { %105 = dma.hbm_to_vmem [thread:$0]  %s3657_s13, 16, %s103_s3, [#allocation10]  }
  0x40   :  { %s2947_s1 = scalar_lea.vmem %s112_s27, 512  ;;  %p2952_p12 = scmp.lt.s32.totalorder %s112_s27, %s112_s27 }
  0x41   :  { %p2948_p11 = scmp.ne.s32.totalorder %s112_s27, %s2947_s1  ;;  %p2953_p13 = scmp.lt.s32.totalorder %s2947_s1, %s2947_s1 }
  0x43   :  { %p2954_p0 = por %p2953_p13, %p2952_p12 }
  0x45   :  { %p2955_p1 = pnand %p2954_p0, %p2948_p11 }
  0x47   :  { %2958 = shalt.err (!%p2955_p1)
}
  0x48   :  { %117 = dma.hbm_to_vmem [thread:$0]  %s3658_s14, 512, %s112_s27, [#allocation13], %s2991_s17, %s2991_s17, %s2992_s23  }
  0x49   :  { %2979 = dma.done.wait [#allocation4], 384  }
  0x4a   :  { %2980 = vsyncadd [#allocation4], 4294966912 }
  0x4b   :  { %2981 = dma.done.wait [#allocation7], 1024  }
  0x4c   :  { %2982 = vsyncadd [#allocation7], 4294966272 }
  0x4d   :  { %2983 = dma.done.wait [#allocation10], 32  }
  0x4e   :  { %2984 = vsyncadd [#allocation10], 4294967264 }
  0x4f   :  { %2985 = dma.done.wait [#allocation13], 512  }
  0x50   :  { %2986 = vsyncadd [#allocation13], 4294966784  ;;  %v2997_v1 = vmov 0   ;;  %v2998_v2 = vmov 0.0   ;;  %vm3667_vm0 = vcmask 261120   ;;  %s3678_s14 = sld [smem:[#allocation23_spill]]  ;;  %v354_v18 = vlaneseq }
  0x51   :  { %2737 = vset.pattern.permute.xlu1 %v2997_v1  ;;  %2549 = vmatprep.subr.mxu1 %v2998_v2  ;;  %v160_v5 = vld [vmem:[#allocation3] sm:$0xff]  ;;  %s3679_s24 = sld [smem:[#allocation21_spill]]  ;;  %v161_v12 = vld [vmem:[#allocation3 + $0x8] sm:$0xff]  ;;  %v2999_v15 = vmov 1   ;;  %vm3669_vm5 = vmmov 0   ;;  %vm3668_vm7 = vcmask 130048  }
  0x52   :  { %2736 = vset.pattern.permute.xlu0 %v2997_v1  ;;  %2543 = vmatprep.mubr.msk.f32.mxu0 %vm3667_vm0, %v160_v5  ;;  %s3680_s0 = sld [smem:[#allocation20_spill]]  ;;  %vm1536_vm8 = vcmask 138240   ;;  %v3187_v21 = vshrl.u32 %v354_v18, 7  ;;  %v2375_v28 = vld [vmem:[%s3648_s4] ss:$0 sm:$0xff]  ;;  %v3685_v45 = vmov 0 }
  0x53   :  { %2553 = vmatprep.mubr.msk.f32.mxu1 %vm3669_vm5, %v2998_v2  ;;  %v164_v35 = vld [vmem:[%s3649_s5] sm:$0x1]  ;;  %v3687_v52 = vmov 0  ;;  %s3001_s27 = smov 32   ;;  %s3003_s4 = smov 127  }
  0x54   :  { %v3190_v22 = vsub.s32 0, %v3187_v21  ;;  %v603_v42 = vsub.s32 1, %v3187_v21  ;;  %s3004_s9 = smov [#allocation14]  }
  0x56   :  { %v168_v3 = vld [vmem:[%s3678_s14 + $0x18] sm:$0xff]  ;;  %v167_v4 = vld [vmem:[%s3678_s14 + $0x10] sm:$0xff]  ;;  %v166_v6 = vld [vmem:[%s3678_s14 + $0x8] sm:$0xff] }
  0x57   :  { %2535 = vmatprep.subr.mxu0 %v168_v3  ;;  %v144_v7 = vld [vmem:[%s3679_s24 + $0x8] sm:$0xff]  ;;  %v143_v8 = vld [vmem:[%s3679_s24] sm:$0xff] }
  0x58   :  { %2536 = vmatpush3.msra.mxu0 %v168_v3  ;;  %vm149_vm1 = vcmp.ne.f32.partialorder %v144_v7, 0.0  ;;  %vm148_vm2 = vcmp.ne.f32.partialorder %v143_v8, 0.0  ;;  %v165_v9 = vld [vmem:[%s3678_s14] sm:$0xff]  ;;  %s2352_s14 = sshll.u32 %s3004_s9, 4  ;;  %s2353_s14 = int_to_ptr.vmem [resolvable:$true] %s2352_s14 }
  0x59   :  { %2537 = vmatprep.subr.mxu0 %v167_v4  ;;  %v2368_v10 = vsel %vm149_vm1, 1.0, %v2998_v2  ;;  %v2367_v11 = vsel %vm148_vm2, 1.0, %v2998_v2  ;;  %v142_v16 = vld [vmem:[%s3680_s0] sm:$0x3]  ;;  %s2959_s17 = scalar_lea.vmem %s2353_s14, 16  ;;  %s2963_s23 = scalar_lea.vmem %s2353_s14, 32 }
  0x5a   :  { %2538 = vmatpush3.msra.mxu0 %v167_v4  ;;  %vm367_vm3 = vcmp.gt.f32.partialorder %v2368_v10, 0.0  ;;  %vm366_vm4 = vcmp.gt.f32.partialorder %v2367_v11, 0.0  ;;  %vm145_vm6 = vcmp.ne.f32.partialorder %v142_v16, 0.0  ;;  %p2960_p2 = scmp.ne.s32.totalorder %s2353_s14, %s2959_s17  ;;  %p2964_p3 = scmp.lt.s32.totalorder %s2353_s14, %s2353_s14 }
  0x5b   :  { %2539 = vmatprep.subr.mxu0 %v166_v6  ;;  %v3163_v13 = vsel %vm367_vm3, 1, %v2997_v1  ;;  %v3168_v14 = vsel %vm366_vm4, 1, %v2997_v1  ;;  %v3183_v17 = vsel %vm145_vm6, 1.0, %v2998_v2  ;;  %p2965_p4 = scmp.lt.s32.totalorder %s2963_s23, %s2959_s17 }
  0x5c   :  { %2540 = vmatpush3.msra.mxu0 %v166_v6  ;;  %375 = vperm.xlu1 %2737, %v3163_v13   ;;  %v1535_v19 = vsel %vm3668_vm7, %v3183_v17, 1.0  ;;  %vm368_vm6 = vcmp.gt.f32.partialorder %v3183_v17, 0.0 }
  0x5d   :  { %2541 = vmatprep.subr.mxu0 %v165_v9  ;;  %v1537_v20 = vsel %vm1536_vm8, %v1535_v19, 0.0  ;;  %v379_v54 = vsel %vm368_vm6, 1, %v2997_v1  ;;  %p2966_p5 = por %p2965_p4, %p2964_p3 }
  0x5e   :  { %2542 = vmatpush3.msra.mxu0 %v165_v9  ;;  %vm1774_vm9 = vcmp.gt.f32.partialorder %v1537_v20, 0.0  ;;  %v383_v55 = vrot.slane %v379_v54, %v3190_v22  ;;  %v604_v61 = vrot.slane %v379_v54, %v603_v42 }
  0x5f   :  { %2544 = vmatmul.mubr.msk.f32.vlgmr.msra.gmra.mxu0 %vm3667_vm0, %v161_v12  ;;  %2563 = vmatprep.subr.mxu0 %v2998_v2  ;;  %v1780_v23 = vsel %vm1774_vm9, 1, %v2997_v1  ;;  %p2967_p6 = pnand %p2966_p5, %p2960_p2 }
  0x60   :  { %2546 = vmatprep.mubr.msk.f32.mxu0 %vm3667_vm0, %v160_v5  ;;  %2738 = vset.pattern.permute.xlu1 %v2999_v15  ;;  %v1784_v24 = vrot.slane %v1780_v23, %v3190_v22  ;;  %v3237_v44 = vrot.slane %v1780_v23, %v603_v42  ;;  %vm384_vm8 = vcmp.eq.s32.totalorder %v383_v55, 1 }
  0x61   :  { %594 = vperm.xlu1 %2738, %v3168_v14  }
  0x62   :  { %vm3196_vm10 = vcmp.eq.s32.totalorder %v1784_v24, 1  ;;  %vm3666_vm14 = vcmp.eq.s32.totalorder %v3237_v44, 1 }
  0x63   :  { %2547 = vmatmul.mubr.msk.f32.gmra.mxu0 %vm3667_vm0, %v161_v12 }
  0x64   :  { %2567 = vmatprep.mubr.msk.f32.mxu0 %vm3669_vm5, %v2998_v2 }
  0xd7   :  { %v3194_v25 = vpop.permute.xlu1 %375 }
  0xd8   :  { %vm378_vm11 = vcmp.eq.s32.totalorder %v3194_v25, 1 }
  0xd9   :  { %vm3205_vm12 = vmand %vm378_vm11, %vm3196_vm10 }
  0xda   :  { %vm3275_vm6 = vmand %vm378_vm11, %vm384_vm8 }
  0xdc   :  { %v595_v43 = vpop.permute.xlu1 %594 }
  0xdd   :  { %vm599_vm13 = vcmp.eq.s32.totalorder %v595_v43, 1 }
  0xde   :  { %vm3243_vm15 = vmand %vm599_vm13, %vm3666_vm14 }
  0xdf   :  { %v3686_v45 = vsel %vm3243_vm15, 4294967295, %v3685_v45  ;;  %vm3703_vm15 = vmmov 0  }
 0x11f   :  { %v2545_v29 = vpop.f32.mrf.mxu0 }
 0x120   :  { %2550 = vmatpush3.xpose.msk.msra.mxu1 %vm3667_vm0, %v2545_v29  ;;  %v268_v30 = vmul.f32 %v2545_v29, %v2375_v28 }
 0x121   :  { %v242_v31 = vpop.f32.mrf.mxu0  ;;  %2551 = vmatprep.subr.mxu1 %v2998_v2 }
 0x122   :  { %v272_v32 = vsel %vm3667_vm0, %v268_v30, 0.0  ;;  %v267_v33 = vmul.f32 %v2375_v28, %v242_v31 }
 0x123   :  { %273 = vadd.xlane.f32.xlu0 %v272_v32  ;;  %v3215_v34 = vpop.f32.mrf.mxu0 }
 0x124   :  { %2552 = vmatpush3.xpose.msk.msra.mxu1 %vm3667_vm0, %v242_v31  ;;  %2564 = vmatpush3.xpose.msk.msra.mxu0 %vm3667_vm0, %v3215_v34  ;;  %v498_v36 = vmul.f32 %v3215_v34, %v2375_v28  ;;  %v269_v38 = vsel %vm3667_vm0, %v267_v33, 0.0 }
 0x125   :  { %v3224_v37 = vpop.f32.mrf.mxu0  ;;  %2556 = vmatprep.subr.mxu1 %v2545_v29  ;;  %2565 = vmatprep.subr.mxu0 %v2998_v2 }
 0x126   :  { %v502_v39 = vsel %vm3667_vm0, %v498_v36, 0.0  ;;  %v497_v40 = vmul.f32 %v2375_v28, %v3224_v37 }
 0x127   :  { %2554 = vmatmul.mubr.msk.f32.vlgmr.msra.gmra.mxu1 %vm3667_vm0, %v164_v35  ;;  %270 = vadd.xlane.f32.xlu0 %v269_v38 }
 0x128   :  { %503 = vadd.xlane.f32.xlu1 %v502_v39  ;;  %2557 = vmatpush3.msra.mxu1 %v2545_v29  ;;  %v499_v41 = vsel %vm3667_vm0, %v497_v40, 0.0 }
 0x129   :  { %2566 = vmatpush3.xpose.msk.msra.mxu0 %vm3667_vm0, %v3224_v37  ;;  %2558 = vmatprep.subr.mxu1 %v242_v31 }
 0x12a   :  { %2559 = vmatpush3.msra.mxu1 %v242_v31 }
 0x12b   :  { %2570 = vmatprep.subr.mxu1 %v3215_v34 }
 0x12c   :  { %2568 = vmatmul.mubr.msk.f32.vlgmr.msra.gmra.mxu0 %vm3667_vm0, %v164_v35  ;;  %500 = vadd.xlane.f32.xlu1 %v499_v41 }
 0x13d   :  { %597 = vperm.xlu1 %2738, %v3163_v13   ;;  %372 = vperm.xlu0 %2736, %v3168_v14  }
 0x141   :  { %2739 = vset.pattern.permute.xlu1 %v2997_v1  ;;  %2740 = vset.pattern.permute.xlu0 %v2999_v15 }
 0x1ac   :  { %v274_v46 = vpop.xlane.xlu0 %273 }
 0x1b0   :  { %v271_v48 = vpop.xlane.xlu0 %270 }
 0x1b1   :  { %v504_v47 = vpop.xlane.xlu1 %503 }
 0x1b5   :  { %v501_v49 = vpop.xlane.xlu1 %500 }
 0x1b8   :  { %v373_v50 = vpop.permute.xlu0 %372 }
 0x1b9   :  { %v598_v51 = vpop.permute.xlu1 %597  ;;  %vm377_vm2 = vcmp.eq.s32.totalorder %v373_v50, 1 }
 0x1ba   :  { %vm600_vm1 = vcmp.eq.s32.totalorder %v598_v51, 1  ;;  %vm3260_vm4 = vmand %vm377_vm2, %vm3196_vm10 }
 0x1bb   :  { %vm3254_vm3 = vmand %vm600_vm1, %vm3666_vm14 }
 0x1bc   :  { %v3688_v52 = vsel %vm3254_vm3, 4294967295, %v3687_v52  ;;  %vm3268_vm9 = vmand %vm377_vm2, %vm384_vm8  ;;  %vm605_vm2 = vcmp.eq.s32.totalorder %v604_v61, 1 }
 0x1e7   :  { %v350_v56 = vpop.f32.mrf.mxu1 }
 0x1e8   :  { %v357_v57 = vrot.slane %v350_v56, %v3190_v22 }
 0x1e9   :  { %v2555_v58 = vpop.f32.mrf.mxu1 }
 0x1ea   :  { %v358_v59 = vadd.f32 %v357_v57, %v271_v48  ;;  %v359_v60 = vadd.f32 %v357_v57, %v274_v46 }
 0x1ec   :  { %v577_v62 = vpop.f32.mrf.mxu0  ;;  %vm361_vm14 = vcmp.gt.f32.partialorder %v359_v60, 0.0  ;;  %v363_v0 = vmul.f32 0.2, %v359_v60  ;;  %vm360_vm0 = vcmp.gt.f32.partialorder %v358_v59, 0.0  ;;  %v362_v3 = vmul.f32 0.2, %v358_v59 }
 0x1ed   :  { %v584_v4 = vrot.slane %v577_v62, %v3190_v22 }
 0x1ee   :  { %v2569_v6 = vpop.f32.mrf.mxu0  ;;  %v365_v7 = vsel %vm361_vm14, %v359_v60, %v363_v0  ;;  %v364_v8 = vsel %vm360_vm0, %v358_v59, %v362_v3  ;;  %vm3286_vm0 = vmand %vm599_vm13, %vm605_vm2 }
 0x1ef   :  { %v585_v9 = vadd.f32 %v584_v4, %v501_v49  ;;  %v586_v10 = vadd.f32 %v584_v4, %v504_v47  ;;  %v388_v11 = vsel %vm3275_vm6, %v365_v7, -1e+30  ;;  %v387_v12 = vsel %vm3268_vm9, %v364_v8, -1e+30  ;;  %vm3293_vm14 = vmand %vm600_vm1, %vm605_vm2 }
 0x1f0   :  { %v393_v13 = vsel %vm3668_vm7, %v388_v11, -inf  ;;  %v390_v14 = vsel %vm3668_vm7, %v387_v12, -inf  ;;  %vm3699_vm2 = vcmask 261120  }
 0x1f1   :  { %394 = vmax.xlane.f32.xlu0 %v393_v13  ;;  %391 = vmax.xlane.f32.xlu1 %v390_v14  ;;  %vm587_vm11 = vcmp.gt.f32.partialorder %v585_v9, 0.0  ;;  %v589_v16 = vmul.f32 0.2, %v585_v9  ;;  %vm588_vm8 = vcmp.gt.f32.partialorder %v586_v10, 0.0  ;;  %v590_v17 = vmul.f32 0.2, %v586_v10  ;;  %vm3702_vm3 = vmmov %vm3699_vm2 }
 0x1f3   :  { %v591_v19 = vsel %vm587_vm11, %v585_v9, %v589_v16  ;;  %v592_v20 = vsel %vm588_vm8, %v586_v10, %v590_v17  ;;  %v746_v16 = vld [vmem:[%s3650_s6 + $0x18] sm:$0xff]  ;;  %v743_v17 = vld [vmem:[%s3650_s6] sm:$0xff]  ;;  %vm3700_vm11 = vmmov %vm3699_vm2 }
 0x1f4   :  { %v608_v21 = vsel %vm3286_vm0, %v591_v19, -1e+30  ;;  %v609_v25 = vsel %vm3293_vm14, %v592_v20, -1e+30  ;;  %2577 = vmatprep.subr.mxu0 %v746_v16 }
 0x1f5   :  { %v610_v24 = vsel %vm3668_vm7, %v608_v21, -inf  ;;  %v613_v28 = vsel %vm3668_vm7, %v609_v25, -inf  ;;  %2578 = vmatpush3.msra.mxu0 %v746_v16 }
 0x1f6   :  { %611 = vmax.xlane.f32.xlu1 %v610_v24 }
 0x1fa   :  { %614 = vmax.xlane.f32.xlu1 %v613_v28 }
 0x27a   :  { %v395_v29 = vpop.xlane.xlu0 %394  ;;  %v392_v30 = vpop.xlane.xlu1 %391 }
 0x27b   :  { %v397_v31 = vsub.f32 %v388_v11, %v395_v29  ;;  %v396_v32 = vsub.f32 %v387_v12, %v392_v30 }
 0x27d   :  { %v400_v33 = vmul.f32 1.442695, %v397_v31  ;;  %v398_v35 = vmul.f32 1.442695, %v396_v32 }
 0x27f   :  { %2753 = vpow2.f32 %v400_v33  ;;  %v612_v36 = vpop.xlane.xlu1 %611 }
 0x280   :  { %2755 = vpow2.f32 %v398_v35  ;;  %v616_v38 = vsub.f32 %v608_v21, %v612_v36 }
 0x282   :  { %v618_v39 = vmul.f32 1.442695, %v616_v38 }
 0x283   :  { %v615_v40 = vpop.xlane.xlu1 %614 }
 0x284   :  { %2757 = vpow2.f32 %v618_v39  ;;  %v617_v41 = vsub.f32 %v609_v25, %v615_v40 }
 0x286   :  { %v620_v42 = vmul.f32 1.442695, %v617_v41 }
 0x288   :  { %2759 = vpow2.f32 %v620_v42 }
 0x28c   :  { %v2754_v43 = vpop.eup %2753 }
 0x28d   :  { %v2756_v46 = vpop.eup %2755  ;;  %v403_v49 = vsel %vm3275_vm6, %v2754_v43, 0.0 }
 0x28e   :  { %v402_v47 = vsel %vm3268_vm9, %v2756_v46, 0.0  ;;  %v407_v54 = vsel %vm3668_vm7, %v403_v49, 0.0 }
 0x28f   :  { %v404_v48 = vsel %vm3668_vm7, %v402_v47, 0.0 }
 0x290   :  { %405 = vadd.xlane.f32.xlu1 %v404_v48 }
 0x291   :  { %v2758_v50 = vpop.eup %2757 }
 0x292   :  { %v622_v51 = vsel %vm3286_vm0, %v2758_v50, 0.0 }
 0x293   :  { %v624_v55 = vsel %vm3668_vm7, %v622_v51, 0.0 }
 0x294   :  { %408 = vadd.xlane.f32.xlu1 %v407_v54  ;;  %625 = vadd.xlane.f32.xlu0 %v624_v55 }
 0x295   :  { %v2760_v56 = vpop.eup %2759 }
 0x296   :  { %v623_v57 = vsel %vm3293_vm14, %v2760_v56, 0.0 }
 0x297   :  { %v627_v58 = vsel %vm3668_vm7, %v623_v57, 0.0 }
 0x298   :  { %628 = vadd.xlane.f32.xlu1 %v627_v58 }
 0x319   :  { %v406_v59 = vpop.xlane.xlu1 %405 }
 0x31a   :  { %v410_v60 = vmax.f32 %v406_v59, 1e-30 }
 0x31c   :  { %2761 = vrcp.f32 %v410_v60 }
 0x31d   :  { %v626_v61 = vpop.xlane.xlu0 %625  ;;  %v409_v62 = vpop.xlane.xlu1 %408 }
 0x31e   :  { %v630_v0 = vmax.f32 %v626_v61, 1e-30  ;;  %v411_v3 = vmax.f32 %v409_v62, 1e-30  ;;  %v742_v61 = vld [vmem:[%s3652_s8] sm:$0x1] }
 0x320   :  { %2763 = vrcp.f32 %v630_v0 }
 0x321   :  { %2765 = vrcp.f32 %v411_v3  ;;  %v629_v4 = vpop.xlane.xlu1 %628 }
 0x322   :  { %v631_v6 = vmax.f32 %v629_v4, 1e-30 }
 0x324   :  { %2767 = vrcp.f32 %v631_v6 }
 0x329   :  { %v2762_v7 = vpop.eup %2761 }
 0x32a   :  { %v414_v8 = vmul.f32 %v2762_v7, %v402_v47 }
 0x32c   :  { %2560 = vmatprep.mubr.msk.f32.mxu1 %vm3668_vm7, %v414_v8 }
 0x32d   :  { %v2764_v9 = vpop.eup %2763 }
 0x32e   :  { %v2766_v10 = vpop.eup %2765  ;;  %v634_v11 = vmul.f32 %v2764_v9, %v622_v51  ;;  %v2394_v51 = vld [vmem:[%s3651_s7] ss:$0 sm:$0xff] }
 0x32f   :  { %v415_v12 = vmul.f32 %v2766_v10, %v403_v49 }
 0x331   :  { %v2768_v13 = vpop.eup %2767  ;;  %2561 = vmatmul.mubr.msk.f32.vlgmr.msra.gmra.mxu1 %vm3668_vm7, %v415_v12 }
 0x332   :  { %2571 = vmatpush3.msra.mxu1 %v3215_v34  ;;  %2574 = vmatprep.mubr.msk.f32.mxu1 %vm3668_vm7, %v634_v11  ;;  %v635_v14 = vmul.f32 %v2768_v13, %v623_v57  ;;  %v745_v34 = vld [vmem:[%s3650_s6 + $0x10] sm:$0xff] }
 0x333   :  { %2572 = vmatprep.subr.mxu1 %v3224_v37  ;;  %2579 = vmatprep.subr.mxu0 %v745_v34 }
 0x334   :  { %2573 = vmatpush3.msra.mxu1 %v3224_v37  ;;  %2580 = vmatpush3.msra.mxu0 %v745_v34  ;;  %v744_v37 = vld [vmem:[%s3650_s6 + $0x8] sm:$0xff] }
 0x335   :  { %2575 = vmatmul.mubr.msk.f32.vlgmr.msra.gmra.mxu1 %vm3668_vm7, %v635_v14  ;;  %2591 = vmatprep.subr.mxu1 %v2998_v2 }
 0x336   :  { %2595 = vmatprep.mubr.msk.f32.mxu1 %vm3669_vm5, %v2998_v2  ;;  %2581 = vmatprep.subr.mxu0 %v744_v37  ;;  %vm3701_vm5 = vmmov %vm3699_vm2 }
 0x337   :  { %2582 = vmatpush3.msra.mxu0 %v744_v37 }
 0x338   :  { %2583 = vmatprep.subr.mxu0 %v743_v17 }
 0x339   :  { %2584 = vmatpush3.msra.mxu0 %v743_v17 }
 0x33a   :  { %2605 = vmatprep.subr.mxu0 %v2998_v2 }
 0x3f1   :  { %v2562_v19 = vpop.f32.mrf.mxu1 }
 0x3f2   :  { %v722_v20 = vmin.f32 %v2562_v19, 0.0  ;;  %vm718_vm1 = vcmp.gt.f32.partialorder %v2562_v19, 0.0 }
 0x3f3   :  { %v488_v21 = vpop.f32.mrf.mxu1 }
 0x3f4   :  { %v727_v24 = vmul.f32 1.442695, %v722_v20  ;;  %v721_v25 = vmin.f32 %v488_v21, 0.0  ;;  %vm717_vm13 = vcmp.gt.f32.partialorder %v488_v21, 0.0 }
 0x3f5   :  { %v2576_v28 = vpop.f32.mrf.mxu1 }
 0x3f6   :  { %2769 = vpow2.f32 %v727_v24  ;;  %v725_v29 = vmul.f32 1.442695, %v721_v25  ;;  %v724_v30 = vmin.f32 %v2576_v28, 0.0  ;;  %vm720_vm7 = vcmp.gt.f32.partialorder %v2576_v28, 0.0 }
 0x3f7   :  { %v708_v31 = vpop.f32.mrf.mxu1 }
 0x3f8   :  { %2771 = vpow2.f32 %v725_v29  ;;  %v731_v32 = vmul.f32 1.442695, %v724_v30  ;;  %v723_v33 = vmin.f32 %v708_v31, 0.0  ;;  %vm719_vm8 = vcmp.gt.f32.partialorder %v708_v31, 0.0 }
 0x3fa   :  { %2773 = vpow2.f32 %v731_v32  ;;  %v729_v35 = vmul.f32 1.442695, %v723_v33 }
 0x3fc   :  { %2775 = vpow2.f32 %v729_v35 }
 0x403   :  { %v2770_v36 = vpop.eup %2769 }
 0x404   :  { %v2387_v39 = vadd.f32 -1.0, %v2770_v36 }
 0x405   :  { %v2772_v38 = vpop.eup %2771 }
 0x406   :  { %v2386_v40 = vadd.f32 -1.0, %v2772_v38  ;;  %v738_v46 = vsel %vm718_vm1, %v2562_v19, %v2387_v39  ;;  %vm3705_vm1 = vmmov %vm3699_vm2 }
 0x407   :  { %v2774_v41 = vpop.eup %2773 }
 0x408   :  { %v737_v42 = vsel %vm717_vm13, %v488_v21, %v2386_v40  ;;  %v2389_v47 = vadd.f32 -1.0, %v2774_v41  ;;  %vm3704_vm13 = vmmov %vm3699_vm2 }
 0x409   :  { %v2776_v43 = vpop.eup %2775  ;;  %2585 = vmatprep.mubr.msk.f32.mxu0 %vm3699_vm2, %v737_v42  ;;  %vm3709_vm2 = vmmov %vm3705_vm1 }
 0x40a   :  { %2586 = vmatmul.mubr.msk.f32.vlgmr.msra.gmra.mxu0 %vm3700_vm11, %v738_v46  ;;  %v2388_v48 = vadd.f32 -1.0, %v2776_v43  ;;  %v740_v50 = vsel %vm720_vm7, %v2576_v28, %v2389_v47  ;;  %vm3707_vm7 = vmmov %vm3705_vm1 }
 0x40b   :  { %vm3710_vm11 = vmmov %vm3705_vm1 }
 0x40c   :  { %v739_v49 = vsel %vm719_vm8, %v708_v31, %v2388_v48  ;;  %vm3711_vm8 = vmmov %vm3705_vm1 }
 0x40d   :  { %2588 = vmatprep.mubr.msk.f32.mxu0 %vm3701_vm5, %v739_v49  ;;  %vm3706_vm5 = vmmov %vm3705_vm1 }
 0x40e   :  { %2589 = vmatmul.mubr.msk.f32.gmra.mxu0 %vm3702_vm3, %v740_v50  ;;  %vm3708_vm3 = vmmov %vm3705_vm1 }
 0x40f   :  { %2609 = vmatprep.mubr.msk.f32.mxu0 %vm3703_vm15, %v2998_v2 }
 0x4ca   :  { %v2587_v54 = vpop.f32.mrf.mxu0 }
 0x4cb   :  { %2592 = vmatpush3.xpose.msk.msra.mxu1 %vm3704_vm13, %v2587_v54  ;;  %v851_v55 = vmul.f32 %v2587_v54, %v2394_v51  ;;  %vm3712_vm13 = vmmov %vm3705_vm1 }
 0x4cc   :  { %v825_v56 = vpop.f32.mrf.mxu0  ;;  %2593 = vmatprep.subr.mxu1 %v2998_v2 }
 0x4cd   :  { %v855_v57 = vsel %vm3705_vm1, %v851_v55, 0.0  ;;  %v850_v58 = vmul.f32 %v2394_v51, %v825_v56 }
 0x4ce   :  { %856 = vadd.xlane.f32.xlu1 %v855_v57  ;;  %v3348_v59 = vpop.f32.mrf.mxu0 }
 0x4cf   :  { %2594 = vmatpush3.xpose.msk.msra.mxu1 %vm3706_vm5, %v825_v56  ;;  %2606 = vmatpush3.xpose.msk.msra.mxu0 %vm3707_vm7, %v3348_v59  ;;  %v852_v60 = vsel %vm3708_vm3, %v850_v58, 0.0  ;;  %v1059_v62 = vmul.f32 %v3348_v59, %v2394_v51  ;;  %vm3713_vm3 = vcmask 130048  }
 0x4d0   :  { %853 = vadd.xlane.f32.xlu0 %v852_v60  ;;  %v3358_v0 = vpop.f32.mrf.mxu0  ;;  %2598 = vmatprep.subr.mxu1 %v2587_v54 }
 0x4d1   :  { %2607 = vmatprep.subr.mxu0 %v2998_v2  ;;  %v1063_v3 = vsel %vm3709_vm2, %v1059_v62, 0.0  ;;  %v1058_v4 = vmul.f32 %v2394_v51, %v3358_v0 }
 0x4d2   :  { %2596 = vmatmul.mubr.msk.f32.vlgmr.msra.gmra.mxu1 %vm3710_vm11, %v742_v61  ;;  %1064 = vadd.xlane.f32.xlu1 %v1063_v3  ;;  %vm3714_vm11 = vmmov %vm3713_vm3 }
 0x4d3   :  { %2599 = vmatpush3.msra.mxu1 %v2587_v54  ;;  %2608 = vmatpush3.xpose.msk.msra.mxu0 %vm3711_vm8, %v3358_v0  ;;  %v1060_v6 = vsel %vm3712_vm13, %v1058_v4, 0.0  ;;  %vm3715_vm13 = vmmov %vm3713_vm3 }
 0x4d4   :  { %2600 = vmatprep.subr.mxu1 %v825_v56  ;;  %1061 = vadd.xlane.f32.xlu0 %v1060_v6 }
 0x4d5   :  { %2601 = vmatpush3.msra.mxu1 %v825_v56 }
 0x4d6   :  { %2610 = vmatmul.mubr.msk.f32.vlgmr.msra.gmra.mxu0 %vm3705_vm1, %v742_v61  ;;  %2612 = vmatprep.subr.mxu1 %v3348_v59  ;;  %vm3716_vm1 = vmmov %vm3713_vm3 }
 0x557   :  { %v857_v7 = vpop.xlane.xlu1 %856 }
 0x559   :  { %v854_v8 = vpop.xlane.xlu0 %853 }
 0x55b   :  { %v1065_v16 = vpop.xlane.xlu1 %1064 }
 0x55d   :  { %v1062_v17 = vpop.xlane.xlu0 %1061 }
 0x592   :  { %v933_v9 = vpop.f32.mrf.mxu1 }
 0x593   :  { %v940_v10 = vrot.slane %v933_v9, %v3190_v22 }
 0x594   :  { %v2597_v11 = vpop.f32.mrf.mxu1 }
 0x595   :  { %v941_v12 = vadd.f32 %v940_v10, %v854_v8  ;;  %v942_v13 = vadd.f32 %v940_v10, %v857_v7 }
 0x596   :  { %v1138_v14 = vpop.f32.mrf.mxu0 }
 0x597   :  { %v1145_v34 = vrot.slane %v1138_v14, %v3190_v22  ;;  %vm943_vm5 = vcmp.gt.f32.partialorder %v941_v12, 0.0  ;;  %v945_v37 = vmul.f32 0.2, %v941_v12  ;;  %vm944_vm7 = vcmp.gt.f32.partialorder %v942_v13, 0.0 }
 0x598   :  { %v2611_v19 = vpop.f32.mrf.mxu0  ;;  %v946_v20 = vmul.f32 0.2, %v942_v13 }
 0x599   :  { %v1146_v21 = vadd.f32 %v1145_v34, %v1062_v17  ;;  %v1147_v24 = vadd.f32 %v1145_v34, %v1065_v16  ;;  %v947_v25 = vsel %vm943_vm5, %v941_v12, %v945_v37  ;;  %vm3717_vm5 = vmmov %vm3716_vm1 }
 0x59a   :  { %v949_v28 = vsel %vm3268_vm9, %v947_v25, -1e+30  ;;  %v948_v29 = vsel %vm944_vm7, %v942_v13, %v946_v20  ;;  %vm3718_vm7 = vmmov %vm3716_vm1 }
 0x59b   :  { %v951_v30 = vsel %vm3713_vm3, %v949_v28, -inf  ;;  %v950_v31 = vsel %vm3275_vm6, %v948_v29, -1e+30  ;;  %vm1148_vm2 = vcmp.gt.f32.partialorder %v1146_v21, 0.0  ;;  %v1150_v32 = vmul.f32 0.2, %v1146_v21  ;;  %vm3719_vm3 = vmmov %vm3716_vm1 }
 0x59c   :  { %952 = vmax.xlane.f32.xlu0 %v951_v30  ;;  %v954_v33 = vsel %vm3714_vm11, %v950_v31, -inf  ;;  %vm1149_vm8 = vcmp.gt.f32.partialorder %v1147_v24, 0.0  ;;  %v1151_v35 = vmul.f32 0.2, %v1147_v24  ;;  %v1290_v29 = vld [vmem:[#allocation6 + $0x18] sm:$0xff]  ;;  %v1289_v30 = vld [vmem:[#allocation6 + $0x10] sm:$0xff] }
 0x59d   :  { %955 = vmax.xlane.f32.xlu1 %v954_v33  ;;  %v1152_v36 = vsel %vm1148_vm2, %v1146_v21, %v1150_v32  ;;  %2619 = vmatprep.subr.mxu0 %v1290_v29  ;;  %v1287_v32 = vld [vmem:[#allocation6] sm:$0xff] }
 0x59e   :  { %v1154_v38 = vsel %vm3286_vm0, %v1152_v36, -1e+30  ;;  %v1153_v39 = vsel %vm1149_vm8, %v1147_v24, %v1151_v35  ;;  %2620 = vmatpush3.msra.mxu0 %v1290_v29 }
 0x59f   :  { %v1156_v40 = vsel %vm3715_vm13, %v1154_v38, -inf  ;;  %v1155_v41 = vsel %vm3293_vm14, %v1153_v39, -1e+30  ;;  %2621 = vmatprep.subr.mxu0 %v1289_v30  ;;  %vm3725_vm13 = vcmask 261120  }
 0x5a0   :  { %1157 = vmax.xlane.f32.xlu0 %v1156_v40  ;;  %v1159_v42 = vsel %vm3716_vm1, %v1155_v41, -inf  ;;  %2622 = vmatpush3.msra.mxu0 %v1289_v30 }
 0x5a1   :  { %1160 = vmax.xlane.f32.xlu1 %v1159_v42 }
 0x625   :  { %v953_v43 = vpop.xlane.xlu0 %952 }
 0x626   :  { %v957_v46 = vsub.f32 %v949_v28, %v953_v43  ;;  %v956_v47 = vpop.xlane.xlu1 %955 }
 0x627   :  { %v958_v48 = vsub.f32 %v950_v31, %v956_v47  ;;  %v1288_v31 = vld [vmem:[#allocation6 + $0x8] sm:$0xff] }
 0x628   :  { %v959_v49 = vmul.f32 1.442695, %v957_v46  ;;  %2623 = vmatprep.subr.mxu0 %v1288_v31 }
 0x629   :  { %v961_v50 = vmul.f32 1.442695, %v958_v48  ;;  %v1158_v51 = vpop.xlane.xlu0 %1157  ;;  %2624 = vmatpush3.msra.mxu0 %v1288_v31 }
 0x62a   :  { %2777 = vpow2.f32 %v959_v49  ;;  %v1162_v54 = vsub.f32 %v1154_v38, %v1158_v51  ;;  %v1161_v55 = vpop.xlane.xlu1 %1160  ;;  %2625 = vmatprep.subr.mxu0 %v1287_v32 }
 0x62b   :  { %2779 = vpow2.f32 %v961_v50  ;;  %v1163_v56 = vsub.f32 %v1155_v41, %v1161_v55  ;;  %2626 = vmatpush3.msra.mxu0 %v1287_v32 }
 0x62c   :  { %v1164_v57 = vmul.f32 1.442695, %v1162_v54  ;;  %2650 = vmatprep.subr.mxu0 %v2998_v2 }
 0x62d   :  { %v1166_v58 = vmul.f32 1.442695, %v1163_v56 }
 0x62e   :  { %2781 = vpow2.f32 %v1164_v57 }
 0x62f   :  { %2783 = vpow2.f32 %v1166_v58 }
 0x637   :  { %v2778_v60 = vpop.eup %2777 }
 0x638   :  { %v2780_v61 = vpop.eup %2779  ;;  %v963_v62 = vsel %vm3268_vm9, %v2778_v60, 0.0  ;;  %vm3720_vm9 = vmmov %vm3716_vm1 }
 0x639   :  { %v965_v3 = vsel %vm3717_vm5, %v963_v62, 0.0  ;;  %v964_v4 = vsel %vm3275_vm6, %v2780_v61, 0.0  ;;  %vm3721_vm6 = vmmov %vm3716_vm1 }
 0x63a   :  { %966 = vadd.xlane.f32.xlu0 %v965_v3  ;;  %v968_v6 = vsel %vm3718_vm7, %v964_v4, 0.0  ;;  %v1545_v3 = vld [vmem:[#allocation8 + $0x10] sm:$0xff] }
 0x63b   :  { %v2782_v7 = vpop.eup %2781  ;;  %969 = vadd.xlane.f32.xlu1 %v968_v6  ;;  %v1543_v6 = vld [vmem:[#allocation8] sm:$0xff] }
 0x63c   :  { %v2784_v8 = vpop.eup %2783  ;;  %v1168_v9 = vsel %vm3286_vm0, %v2782_v7, 0.0  ;;  %vm3722_vm0 = vmmov %vm3716_vm1 }
 0x63d   :  { %v1170_v10 = vsel %vm3719_vm3, %v1168_v9, 0.0  ;;  %v1169_v63 = vsel %vm3293_vm14, %v2784_v8, 0.0  ;;  %vm3723_vm14 = vmmov %vm3722_vm0  ;;  %v2409_v8 = vld [vmem:[%s3654_s10] ss:$0 sm:$0xff] }
 0x63e   :  { %1171 = vadd.xlane.f32.xlu0 %v1170_v10  ;;  %v1173_v11 = vsel %vm3720_vm9, %v1169_v63, 0.0  ;;  %vm3724_vm2 = vmmov %vm3722_vm0 }
 0x63f   :  { %1174 = vadd.xlane.f32.xlu1 %v1173_v11  ;;  %vm3726_vm1 = vmmov %vm3725_vm13 }
 0x640   :  { %vm3727_vm3 = vmmov %vm3726_vm1 }
 0x641   :  { %vm3728_vm9 = vmmov %vm3726_vm1 }
 0x6c3   :  { %v967_v5 = vpop.xlane.xlu0 %966 }
 0x6c4   :  { %v971_v12 = vmax.f32 %v967_v5, 1e-30  ;;  %v970_v13 = vpop.xlane.xlu1 %969 }
 0x6c5   :  { %v972_v14 = vmax.f32 %v970_v13, 1e-30 }
 0x6c6   :  { %2785 = vrcp.f32 %v971_v12 }
 0x6c7   :  { %2787 = vrcp.f32 %v972_v14  ;;  %v1172_v16 = vpop.xlane.xlu0 %1171 }
 0x6c8   :  { %v1176_v34 = vmax.f32 %v1172_v16, 1e-30  ;;  %v1175_v37 = vpop.xlane.xlu1 %1174 }
 0x6c9   :  { %v1177_v18 = vmax.f32 %v1175_v37, 1e-30 }
 0x6ca   :  { %2789 = vrcp.f32 %v1176_v34  ;;  %v2424_v34 = vld [vmem:[#allocation9] ss:$0 sm:$0xff] }
 0x6cb   :  { %2791 = vrcp.f32 %v1177_v18 }
 0x6d3   :  { %v2786_v17 = vpop.eup %2785 }
 0x6d4   :  { %v2788_v19 = vpop.eup %2787  ;;  %v975_v23 = vmul.f32 %v2786_v17, %v963_v62 }
 0x6d5   :  { %v976_v20 = vmul.f32 %v2788_v19, %v964_v4  ;;  %v1544_v4 = vld [vmem:[#allocation8 + $0x8] sm:$0xff] }
 0x6d6   :  { %2602 = vmatprep.mubr.msk.f32.mxu1 %vm3721_vm6, %v975_v23  ;;  %vm1538_vm6 = vcmask 1040384  }
 0x6d7   :  { %v2790_v21 = vpop.eup %2789  ;;  %2603 = vmatmul.mubr.msk.f32.vlgmr.msra.gmra.mxu1 %vm3722_vm0, %v976_v20  ;;  %vm3729_vm0 = vmmov %vm3726_vm1 }
 0x6d8   :  { %v2792_v24 = vpop.eup %2791  ;;  %2613 = vmatpush3.msra.mxu1 %v3348_v59  ;;  %v1180_v25 = vmul.f32 %v2790_v21, %v1168_v9  ;;  %v1546_v59 = vld [vmem:[#allocation8 + $0x18] sm:$0xff] }
 0x6d9   :  { %2614 = vmatprep.subr.mxu1 %v3358_v0  ;;  %v1181_v28 = vmul.f32 %v2792_v24, %v1169_v63  ;;  %v162_v9 = vld [vmem:[#allocation3 + $0x10] sm:$0x1] }
 0x6da   :  { %2615 = vmatpush3.msra.mxu1 %v3358_v0  ;;  %2616 = vmatprep.mubr.msk.f32.mxu1 %vm3723_vm14, %v1180_v25  ;;  %v1540_v12 = vsel %vm1538_vm6, %v162_v9, 0.0  ;;  %vm3730_vm14 = vmmov %vm3729_vm0 }
 0x6db   :  { %2617 = vmatmul.mubr.msk.f32.vlgmr.msra.gmra.mxu1 %vm3724_vm2, %v1181_v28  ;;  %2633 = vmatprep.subr.mxu1 %v1546_v59  ;;  %vm3731_vm2 = vmmov %vm3729_vm0 }
 0x6dc   :  { %2634 = vmatpush3.msra.mxu1 %v1546_v59 }
 0x6dd   :  { %2635 = vmatprep.subr.mxu1 %v1545_v3 }
 0x6de   :  { %2636 = vmatpush3.msra.mxu1 %v1545_v3 }
 0x6df   :  { %2637 = vmatprep.subr.mxu1 %v1544_v4 }
 0x6e0   :  { %2638 = vmatpush3.msra.mxu1 %v1544_v4 }
 0x6e1   :  { %2639 = vmatprep.subr.mxu1 %v1543_v6 }
 0x6e2   :  { %2640 = vmatpush3.msra.mxu1 %v1543_v6 }
 0x6e3   :  { %2659 = vmatprep.subr.mxu1 %v2998_v2 }
 0x797   :  { %v2604_v0 = vpop.f32.mrf.mxu1 }
 0x798   :  { %v1268_v33 = vmin.f32 %v2604_v0, 0.0  ;;  %vm1264_vm8 = vcmp.gt.f32.partialorder %v2604_v0, 0.0 }
 0x799   :  { %v1049_v35 = vpop.f32.mrf.mxu1 }
 0x79a   :  { %v1273_v36 = vmul.f32 1.442695, %v1268_v33  ;;  %v1267_v38 = vmin.f32 %v1049_v35, 0.0  ;;  %vm1263_vm11 = vcmp.gt.f32.partialorder %v1049_v35, 0.0 }
 0x79b   :  { %v2618_v39 = vpop.f32.mrf.mxu1 }
 0x79c   :  { %2793 = vpow2.f32 %v1273_v36  ;;  %v1271_v40 = vmul.f32 1.442695, %v1267_v38  ;;  %v1270_v41 = vmin.f32 %v2618_v39, 0.0  ;;  %vm1266_vm7 = vcmp.gt.f32.partialorder %v2618_v39, 0.0 }
 0x79d   :  { %v1254_v42 = vpop.f32.mrf.mxu1  ;;  %v1539_v38 = vsel %vm1538_vm6, 1.0, %v2998_v2 }
 0x79e   :  { %2795 = vpow2.f32 %v1271_v40  ;;  %v1277_v43 = vmul.f32 1.442695, %v1270_v41  ;;  %v1269_v46 = vmin.f32 %v1254_v42, 0.0  ;;  %vm1265_vm5 = vcmp.gt.f32.partialorder %v1254_v42, 0.0 }
 0x7a0   :  { %2797 = vpow2.f32 %v1277_v43  ;;  %v1275_v47 = vmul.f32 1.442695, %v1269_v46 }
 0x7a2   :  { %2799 = vpow2.f32 %v1275_v47 }
 0x7a9   :  { %v2794_v48 = vpop.eup %2793 }
 0x7aa   :  { %v2406_v50 = vadd.f32 -1.0, %v2794_v48 }
 0x7ab   :  { %v2796_v49 = vpop.eup %2795 }
 0x7ac   :  { %v2405_v51 = vadd.f32 -1.0, %v2796_v49  ;;  %v1284_v57 = vsel %vm1264_vm8, %v2604_v0, %v2406_v50  ;;  %vm3733_vm8 = vmmov %vm3729_vm0 }
 0x7ad   :  { %v2798_v54 = vpop.eup %2797 }
 0x7ae   :  { %v1283_v55 = vsel %vm1263_vm11, %v1049_v35, %v2405_v51  ;;  %v2408_v58 = vadd.f32 -1.0, %v2798_v54  ;;  %vm3732_vm11 = vmmov %vm3729_vm0  ;;  %v1542_v35 = vld [vmem:[#allocation11] sm:$0x1] }
 0x7af   :  { %v2800_v56 = vpop.eup %2799  ;;  %2627 = vmatprep.mubr.msk.f32.mxu0 %vm3725_vm13, %v1283_v55  ;;  %vm3734_vm13 = vmmov %vm3729_vm0 }
 0x7b0   :  { %2628 = vmatmul.mubr.msk.f32.vlgmr.msra.gmra.mxu0 %vm3726_vm1, %v1284_v57  ;;  %v2407_v60 = vadd.f32 -1.0, %v2800_v56  ;;  %v1286_v62 = vsel %vm1266_vm7, %v2618_v39, %v2408_v58  ;;  %vm3735_vm1 = vmmov %vm3729_vm0 }
 0x7b1   :  { %vm3737_vm7 = vmmov %vm3729_vm0 }
 0x7b2   :  { %v1285_v61 = vsel %vm1265_vm5, %v1254_v42, %v2407_v60  ;;  %vm3736_vm5 = vmmov %vm3729_vm0 }
 0x7b3   :  { %2630 = vmatprep.mubr.msk.f32.mxu0 %vm3727_vm3, %v1285_v61  ;;  %vm3738_vm3 = vmmov %vm3729_vm0 }
 0x7b4   :  { %2631 = vmatmul.mubr.msk.f32.gmra.mxu0 %vm3728_vm9, %v1286_v62  ;;  %vm3739_vm9 = vmmov %vm3729_vm0 }
 0x7b5   :  { %2656 = vmatprep.mubr.msk.f32.mxu0 %vm3703_vm15, %v2998_v2 }
 0x870   :  { %v2629_v7 = vpop.f32.mrf.mxu0 }
 0x871   :  { %v3415_v11 = vadd.f32 %v2629_v7, %v2409_v8 }
 0x872   :  { %v1376_v10 = vpop.f32.mrf.mxu0 }
 0x873   :  { %v3413_v63 = vadd.f32 %v2409_v8, %v1376_v10 }
 0x874   :  { %v2632_v5 = vpop.f32.mrf.mxu0 }
 0x875   :  { %2641 = vmatprep.mubr.msk.f32.mxu1 %vm3729_vm0, %v3413_v63  ;;  %v3425_v16 = vadd.f32 %v2632_v5, %v2409_v8 }
 0x876   :  { %v1386_v13 = vpop.f32.mrf.mxu0  ;;  %2642 = vmatmul.mubr.msk.f32.vlgmr.msra.gmra.mxu1 %vm3730_vm14, %v3415_v11  ;;  %vm3740_vm14 = vmmov %vm3729_vm0 }
 0x877   :  { %v3422_v14 = vadd.f32 %v2409_v8, %v1386_v13  ;;  %2644 = vmatprep.mubr.msk.f32.mxu1 %vm3731_vm2, %v1540_v12  ;;  %vm3741_vm2 = vmmov %vm3729_vm0 }
 0x87a   :  { %2645 = vmatmul.mubr.msk.f32.gmra.mxu1 %vm3732_vm11, %v3422_v14  ;;  %vm3742_vm11 = vmmov %vm3729_vm0 }
 0x87b   :  { %2647 = vmatprep.mubr.msk.f32.mxu1 %vm3733_vm8, %v3425_v16  ;;  %vm3743_vm8 = vmmov %vm3729_vm0 }
 0x87e   :  { %2648 = vmatmul.mubr.msk.f32.gmra.mxu1 %vm3734_vm13, %v1540_v12  ;;  %vm3744_vm13 = vmmov %vm3729_vm0 }
 0x87f   :  { %2665 = vmatprep.mubr.msk.f32.mxu1 %vm3703_vm15, %v2998_v2 }
 0x936   :  { %v2643_v37 = vpop.f32.mrf.mxu1 }
 0x937   :  { %v1664_v18 = vmul.f32 %v2643_v37, %v2424_v34 }
 0x938   :  { %v1628_v17 = vpop.f32.mrf.mxu1 }
 0x939   :  { %v1669_v19 = vsel %vm3735_vm1, %v1664_v18, 0.0  ;;  %v1663_v23 = vmul.f32 %v2424_v34, %v1628_v17  ;;  %vm1773_vm1 = vcmp.gt.f32.partialorder %v1539_v38, 0.0 }
 0x93a   :  { %1670 = vadd.xlane.f32.xlu1 %v1669_v19  ;;  %v3435_v20 = vpop.f32.mrf.mxu1  ;;  %v1775_v39 = vsel %vm1773_vm1, 1, %v2997_v1 }
 0x93b   :  { %v1666_v21 = vsel %vm3736_vm5, %v1663_v23, 0.0  ;;  %v1919_v24 = vmul.f32 %v3435_v20, %v2424_v34  ;;  %vm3745_vm5 = vmmov %vm3729_vm0 }
 0x93c   :  { %1667 = vadd.xlane.f32.xlu0 %v1666_v21  ;;  %v1638_v25 = vpop.f32.mrf.mxu1 }
 0x93d   :  { %2651 = vmatpush3.xpose.msk.msra.mxu0 %vm3737_vm7, %v1638_v25  ;;  %2660 = vmatpush3.msra.mxu1 %v1638_v25  ;;  %v1922_v28 = vsel %vm3738_vm3, %v1919_v24, 0.0  ;;  %v1665_v29 = vmul.f32 %v2424_v34, %v1638_v25  ;;  %vm3746_vm7 = vmmov %vm3729_vm0 }
 0x93e   :  { %1923 = vadd.xlane.f32.xlu1 %v1922_v28  ;;  %2661 = vmatprep.subr.mxu1 %v2998_v2  ;;  %v3442_v30 = vpop.f32.mrf.mxu1  ;;  %vm3747_vm3 = vmmov %vm3729_vm0 }
 0x93f   :  { %2662 = vmatpush3.msra.mxu1 %v2643_v37  ;;  %2652 = vmatprep.subr.mxu0 %v2998_v2  ;;  %v1672_v31 = vsel %vm3739_vm9, %v1665_v29, 0.0  ;;  %v1921_v32 = vmul.f32 %v3442_v30, %v2424_v34 }
 0x940   :  { %2663 = vmatprep.subr.mxu1 %v2998_v2  ;;  %1673 = vadd.xlane.f32.xlu0 %v1672_v31  ;;  %v3448_v59 = vpop.f32.mrf.mxu1 }
 0x941   :  { %2653 = vmatpush3.xpose.msk.msra.mxu0 %vm3729_vm0, %v2643_v37  ;;  %2664 = vmatpush3.msra.mxu1 %v1628_v17  ;;  %v1928_v0 = vsel %vm3740_vm14, %v1921_v32, 0.0  ;;  %v1920_v33 = vmul.f32 %v2424_v34, %v3448_v59 }
 0x942   :  { %2654 = vmatprep.subr.mxu0 %v2998_v2  ;;  %2683 = vmatprep.subr.mxu1 %v2998_v2 }
 0x943   :  { %v1925_v36 = vsel %vm3742_vm11, %v1920_v33, 0.0 }
 0x944   :  { %1929 = vadd.xlane.f32.xlu0 %v1928_v0 }
 0x945   :  { %2655 = vmatpush3.xpose.msk.msra.mxu0 %vm3741_vm2, %v1628_v17  ;;  %vm1792_vm2 = vcmask 195584  }
 0x946   :  { %2674 = vmatprep.subr.mxu0 %v2998_v2 }
 0x948   :  { %2657 = vmatmul.mubr.msk.f32.vlgmr.msra.gmra.mxu0 %vm3743_vm8, %v1542_v35  ;;  %1926 = vadd.xlane.f32.xlu0 %v1925_v36 }
 0x949   :  { %2675 = vmatpush3.xpose.msk.msra.mxu0 %vm3744_vm13, %v3442_v30  ;;  %2680 = vmatprep.mubr.msk.f32.mxu0 %vm3703_vm15, %v2998_v2 }
 0x94a   :  { %2676 = vmatprep.subr.mxu0 %v2998_v2 }
 0x94d   :  { %2677 = vmatpush3.xpose.msk.msra.mxu0 %vm3745_vm5, %v3448_v59  ;;  %vm3750_vm5 = vnez %v3686_v45 }
 0x94e   :  { %2678 = vmatprep.subr.mxu0 %v2998_v2 }
 0x94f   :  { %1777 = vperm.xlu1 %2739, %v1775_v39  }
 0x951   :  { %2679 = vmatpush3.xpose.msk.msra.mxu0 %vm3746_vm7, %v3435_v20 }
 0x952   :  { %2698 = vmatprep.subr.mxu0 %v2998_v2 }
 0x953   :  { %2741 = vset.pattern.permute.xlu1 %v2999_v15 }
 0x954   :  { %2681 = vmatmul.mubr.msk.f32.vlgmr.msra.gmra.mxu0 %vm3747_vm3, %v1542_v35  ;;  %vm3751_vm3 = vnez %v3688_v52  ;;  %v2838_v52 = vld [vmem:[%s3679_s24] sm:$0xff] }
 0x955   :  { %2706 = vmatprep.mubr.msk.f32.mxu0 %vm3703_vm15, %v2998_v2 }
 0x95e   :  { %2027 = vperm.xlu0 %2740, %v1775_v39  }
 0x9c3   :  { %v1671_v40 = vpop.xlane.xlu1 %1670 }
 0x9c5   :  { %v1668_v41 = vpop.xlane.xlu0 %1667 }
 0x9c7   :  { %v1924_v42 = vpop.xlane.xlu1 %1923 }
 0x9c9   :  { %v1674_v48 = vpop.xlane.xlu0 %1673 }
 0x9cb   :  { %v1778_v47 = vpop.permute.xlu1 %1777 }
 0x9cc   :  { %vm1779_vm9 = vcmp.eq.s32.totalorder %v1778_v47, 1 }
 0x9cd   :  { %v1930_v57 = vpop.xlane.xlu0 %1929  ;;  %vm3480_vm8 = vmand %vm1779_vm9, %vm3196_vm10  ;;  %vm3752_vm9 = vcmp.eq.s32.totalorder %v3237_v44, 1 }
 0x9d1   :  { %v1927_v9 = vpop.xlane.xlu0 %1926 }
 0x9d9   :  { %v2028_v18 = vpop.permute.xlu0 %2027 }
 0x9da   :  { %vm2029_vm1 = vcmp.eq.s32.totalorder %v2028_v18, 1  ;;  %v1472_v18 = vmul.f32 %v3425_v16, %v3425_v16 }
 0xa08   :  { %v1753_v43 = vpop.f32.mrf.mxu0 }
 0xa09   :  { %v1760_v46 = vrot.slane %v1753_v43, %v3190_v22 }
 0xa0a   :  { %v2658_v49 = vpop.f32.mrf.mxu0 }
 0xa0b   :  { %v1761_v50 = vadd.f32 %v1760_v46, %v1668_v41  ;;  %v1762_v51 = vadd.f32 %v1760_v46, %v1671_v40  ;;  %v1763_v54 = vadd.f32 %v1760_v46, %v1674_v48 }
 0xa0d   :  { %vm1764_vm0 = vcmp.gt.f32.partialorder %v1761_v50, 0.0  ;;  %v1767_v15 = vmul.f32 0.2, %v1761_v50  ;;  %vm1765_vm14 = vcmp.gt.f32.partialorder %v1762_v51, 0.0  ;;  %v1768_v55 = vmul.f32 0.2, %v1762_v51 }
 0xa0e   :  { %vm1766_vm11 = vcmp.gt.f32.partialorder %v1763_v54, 0.0  ;;  %v1769_v56 = vmul.f32 0.2, %v1763_v54 }
 0xa0f   :  { %v1770_v60 = vsel %vm1764_vm0, %v1761_v50, %v1767_v15  ;;  %v1771_v61 = vsel %vm1765_vm14, %v1762_v51, %v1768_v55  ;;  %vm3501_vm0 = vmand %vm2029_vm1, %vm3752_vm9  ;;  %vm3755_vm14 = vcmask 261120  }
 0xa10   :  { %v1789_v62 = vsel %vm3260_vm4, %v1770_v60, -1e+30  ;;  %v1790_v3 = vsel %vm3205_vm12, %v1771_v61, -1e+30  ;;  %v1772_v4 = vsel %vm1766_vm11, %v1763_v54, %v1769_v56 }
 0xa11   :  { %v1793_v6 = vsel %vm1792_vm2, %v1789_v62, -inf  ;;  %v1796_v7 = vsel %vm1792_vm2, %v1790_v3, -inf  ;;  %v1791_v26 = vsel %vm3480_vm8, %v1772_v4, -1e+30 }
 0xa12   :  { %1794 = vmax.xlane.f32.xlu1 %v1793_v6  ;;  %1797 = vmax.xlane.f32.xlu0 %v1796_v7  ;;  %v1799_v5 = vsel %vm1792_vm2, %v1791_v26, -inf }
 0xa14   :  { %v2006_v8 = vpop.f32.mrf.mxu0 }
 0xa15   :  { %v2013_v10 = vrot.slane %v2006_v8, %v3190_v22 }
 0xa16   :  { %1800 = vmax.xlane.f32.xlu1 %v1799_v5  ;;  %v2682_v12 = vpop.f32.mrf.mxu0 }
 0xa17   :  { %v2014_v13 = vadd.f32 %v2013_v10, %v1924_v42  ;;  %v2015_v34 = vadd.f32 %v2013_v10, %v1927_v9  ;;  %v2016_v37 = vadd.f32 %v2013_v10, %v1930_v57  ;;  %v2837_v12 = vld [vmem:[%s3679_s24 + $0x8] sm:$0xff]  ;;  %s3002_s24 = smov 96  }
 0xa19   :  { %vm2017_vm10 = vcmp.gt.f32.partialorder %v2014_v13, 0.0  ;;  %v2020_v17 = vmul.f32 0.2, %v2014_v13  ;;  %vm2018_vm13 = vcmp.gt.f32.partialorder %v2015_v34, 0.0  ;;  %v2021_v19 = vmul.f32 0.2, %v2015_v34 }
 0xa1a   :  { %v2022_v24 = vmul.f32 0.2, %v2016_v37  ;;  %vm2019_vm7 = vcmp.gt.f32.partialorder %v2016_v37, 0.0 }
 0xa1b   :  { %v2023_v23 = vsel %vm2017_vm10, %v2014_v13, %v2020_v17  ;;  %v2024_v21 = vsel %vm2018_vm13, %v2015_v34, %v2021_v19  ;;  %v1471_v17 = vmul.f32 %v3422_v14, %v3422_v14  ;;  %v1403_v19 = vmul.f32 %v3413_v63, %v3413_v63 }
 0xa1c   :  { %v2038_v25 = vsel %vm3750_vm5, %v2023_v23, -1e+30  ;;  %v2039_v28 = vsel %vm3751_vm3, %v2024_v21, -1e+30  ;;  %v2025_v31 = vsel %vm2019_vm7, %v2016_v37, %v2022_v24  ;;  %v1404_v23 = vmul.f32 %v3415_v11, %v3415_v11 }
 0xa1d   :  { %v2041_v22 = vsel %vm1792_vm2, %v2038_v25, -inf  ;;  %v2044_v32 = vsel %vm1792_vm2, %v2039_v28, -inf  ;;  %v2040_v0 = vsel %vm3501_vm0, %v2025_v31, -1e+30  ;;  %v1465_v21 = vmul.f32 1.442695, %v3425_v16 }
 0xa1e   :  { %2042 = vmax.xlane.f32.xlu1 %v2041_v22  ;;  %v2047_v33 = vsel %vm1792_vm2, %v2040_v0, -inf  ;;  %v1463_v24 = vmul.f32 1.442695, %v3422_v14  ;;  %v1397_v22 = vmul.f32 1.442695, %v3415_v11  ;;  %vm1514_vm10 = vcmask 15368  }
 0xa1f   :  { %v1395_v31 = vmul.f32 1.442695, %v3413_v63  ;;  %vm1533_vm13 = vcmask 0  }
 0xa22   :  { %2045 = vmax.xlane.f32.xlu1 %v2044_v32 }
 0xa26   :  { %2048 = vmax.xlane.f32.xlu1 %v2047_v33 }
 0xa9b   :  { %v1795_v35 = vpop.xlane.xlu1 %1794  ;;  %v1798_v36 = vpop.xlane.xlu0 %1797 }
 0xa9c   :  { %v1802_v38 = vsub.f32 %v1789_v62, %v1795_v35  ;;  %v1803_v39 = vsub.f32 %v1790_v3, %v1798_v36 }
 0xa9e   :  { %v1805_v40 = vmul.f32 1.442695, %v1802_v38  ;;  %v1807_v44 = vmul.f32 1.442695, %v1803_v39 }
 0xa9f   :  { %v1801_v41 = vpop.xlane.xlu1 %1800 }
 0xaa0   :  { %2801 = vpow2.f32 %v1805_v40  ;;  %v1804_v42 = vsub.f32 %v1791_v26, %v1801_v41 }
 0xaa1   :  { %2803 = vpow2.f32 %v1807_v44 }
 0xaa2   :  { %v1809_v43 = vmul.f32 1.442695, %v1804_v42 }
 0xaa4   :  { %2805 = vpow2.f32 %v1809_v43 }
 0xaa7   :  { %v2043_v46 = vpop.xlane.xlu1 %2042 }
 0xaa8   :  { %v2050_v47 = vsub.f32 %v2038_v25, %v2043_v46 }
 0xaaa   :  { %v2053_v48 = vmul.f32 1.442695, %v2050_v47 }
 0xaab   :  { %v2046_v49 = vpop.xlane.xlu1 %2045 }
 0xaac   :  { %2807 = vpow2.f32 %v2053_v48  ;;  %v2051_v50 = vsub.f32 %v2039_v28, %v2046_v49 }
 0xaad   :  { %v2802_v51 = vpop.eup %2801 }
 0xaae   :  { %v2804_v54 = vpop.eup %2803  ;;  %v2055_v15 = vmul.f32 1.442695, %v2051_v50  ;;  %v3511_v55 = vsel %vm3260_vm4, %v2802_v51, 0.0  ;;  %vm154_vm4 = vcmp.eq.f32.partialorder %v2838_v52, 1.0 }
 0xaaf   :  { %v2049_v56 = vpop.xlane.xlu1 %2048  ;;  %v1814_v57 = vsel %vm1792_vm2, %v3511_v55, 0.0  ;;  %v3517_v61 = vsel %vm3205_vm12, %v2804_v54, 0.0  ;;  %vm155_vm12 = vcmp.eq.f32.partialorder %v2837_v12, 1.0  ;;  %v3555_v34 = vsel %vm154_vm4, 1.0, %v2998_v2 }
 0xab0   :  { %2809 = vpow2.f32 %v2055_v15  ;;  %v2052_v60 = vsub.f32 %v2040_v0, %v2049_v56  ;;  %1815 = vadd.xlane.f32.xlu1 %v1814_v57  ;;  %v1817_v4 = vsel %vm1792_vm2, %v3517_v61, 0.0  ;;  %v3552_v13 = vsel %vm155_vm12, 1.0, %v2998_v2 }
 0xab1   :  { %v2806_v62 = vpop.eup %2805  ;;  %v2742_v37 = vpack.i.bf16 %v3552_v13, %v3555_v34 }
 0xab2   :  { %v2057_v3 = vmul.f32 1.442695, %v2052_v60  ;;  %v3523_v53 = vsel %vm3480_vm8, %v2806_v62, 0.0 }
 0xab3   :  { %v1820_v6 = vsel %vm1792_vm2, %v3523_v53, 0.0 }
 0xab4   :  { %2811 = vpow2.f32 %v2057_v3  ;;  %1818 = vadd.xlane.f32.xlu1 %v1817_v4 }
 0xab5   :  { %2813 = vpow2.f32 %v1465_v21  ;;  %v2174_v21 = vld [vmem:[#allocation12 + $0x8] sm:$0xff] }
 0xab6   :  { %2815 = vpow2.f32 %v1463_v24  ;;  %v2173_v24 = vld [vmem:[#allocation12] sm:$0xff] }
 0xab8   :  { %1821 = vadd.xlane.f32.xlu1 %v1820_v6 }
 0xab9   :  { %v2808_v7 = vpop.eup %2807 }
 0xaba   :  { %v3529_v27 = vsel %vm3750_vm5, %v2808_v7, 0.0 }
 0xabb   :  { %v2062_v26 = vsel %vm1792_vm2, %v3529_v27, 0.0 }
 0xabc   :  { %2063 = vadd.xlane.f32.xlu0 %v2062_v26 }
 0xabd   :  { %v2810_v8 = vpop.eup %2809 }
 0xabe   :  { %v3535_v9 = vsel %vm3751_vm3, %v2810_v8, 0.0 }
 0xabf   :  { %v2065_v58 = vsel %vm1792_vm2, %v3535_v9, 0.0 }
 0xac0   :  { %2066 = vadd.xlane.f32.xlu1 %v2065_v58 }
 0xac1   :  { %v2812_v10 = vpop.eup %2811 }
 0xac2   :  { %v3541_v5 = vsel %vm3501_vm0, %v2812_v10, 0.0  ;;  %v2814_v36 = vpop.eup %2813 }
 0xac3   :  { %v2068_v45 = vsel %vm1792_vm2, %v3541_v5, 0.0  ;;  %v2816_v38 = vpop.eup %2815  ;;  %v1468_v42 = vsub.f32 %v2814_v36, %v3425_v16 }
 0xac4   :  { %2069 = vadd.xlane.f32.xlu0 %v2068_v45  ;;  %v1467_v46 = vsub.f32 %v2816_v38, %v3422_v14 }
 0xac5   :  { %v2417_v16 = vadd.f32 -1.0, %v1468_v42 }
 0xad1   :  { %2743 = vperm.xlu1 %2741, %v2742_v37  }
 0xad5   :  { %1477 = vrot.lane.b32.xlu1 %v1472_v18, %s3001_s27 }
 0xad6   :  { %2747 = vset.pattern.permute.xlu1 %v2997_v1 }
 0xad9   :  { %2749 = vperm.xlu1 %2747, %v2742_v37  }
 0xada   :  { %1475 = vrot.lane.b32.xlu0 %v1471_v17, %s3001_s27 }
 0xadd   :  { %1407 = vrot.lane.b32.xlu1 %v1403_v19, %s3001_s27 }
 0xade   :  { %1409 = vrot.lane.b32.xlu0 %v1404_v23, %s3001_s27  ;;  %v2176_v23 = vld [vmem:[#allocation12 + $0x18] sm:$0xff] }
 0xadf   :  { %2699 = vmatpush3.msra.mxu0 %v2176_v23 }
 0xae0   :  { %2700 = vmatprep.subr.mxu0 %v2998_v2 }
 0xb39   :  { %v1816_v25 = vpop.xlane.xlu1 %1815 }
 0xb3a   :  { %v1823_v1 = vmax.f32 %v1816_v25, 1e-30 }
 0xb3c   :  { %2817 = vrcp.f32 %v1823_v1 }
 0xb3d   :  { %v1819_v28 = vpop.xlane.xlu1 %1818  ;;  %2819 = vpow2.f32 %v1397_v22 }
 0xb3e   :  { %v1824_v29 = vmax.f32 %v1819_v28, 1e-30 }
 0xb40   :  { %2821 = vrcp.f32 %v1824_v29 }
 0xb41   :  { %v1822_v32 = vpop.xlane.xlu1 %1821  ;;  %2823 = vpow2.f32 %v1395_v31 }
 0xb42   :  { %v1825_v0 = vmax.f32 %v1822_v32, 1e-30 }
 0xb44   :  { %2825 = vrcp.f32 %v1825_v0 }
 0xb45   :  { %v2064_v33 = vpop.xlane.xlu0 %2063 }
 0xb46   :  { %v2071_v35 = vmax.f32 %v2064_v33, 1e-30 }
 0xb48   :  { %2827 = vrcp.f32 %v2071_v35 }
 0xb49   :  { %v2818_v39 = vpop.eup %2817  ;;  %v2067_v40 = vpop.xlane.xlu1 %2066 }
 0xb4a   :  { %v1829_v44 = vmul.f32 %v2818_v39, %v3511_v55  ;;  %v2072_v41 = vmax.f32 %v2067_v40, 1e-30  ;;  %v2820_v43 = vpop.eup %2819 }
 0xb4b   :  { %v1400_v54 = vsub.f32 %v2820_v43, %v3415_v11 }
 0xb4c   :  { %2829 = vrcp.f32 %v2072_v41  ;;  %2666 = vmatmul.mubr.msk.f32.vlgmr.msra.gmra.mxu1 %vm1792_vm2, %v1829_v44 }
 0xb4d   :  { %v2822_v47 = vpop.eup %2821  ;;  %2684 = vmatpush3.msra.mxu1 %v3442_v30  ;;  %v2744_v48 = vpop.permute.xlu1 %2743  ;;  %2668 = vmatprep.mubr.msk.f32.mxu1 %vm3703_vm15, %v2998_v2  ;;  %v2416_v30 = vadd.f32 -1.0, %v1467_v46  ;;  %v2415_v4 = vadd.f32 -1.0, %v1400_v54 }
 0xb4e   :  { %v2070_v49 = vpop.xlane.xlu0 %2069  ;;  %2685 = vmatprep.subr.mxu1 %v2998_v2  ;;  %v1830_v51 = vmul.f32 %v2822_v47, %v3517_v61  ;;  %v2824_v15 = vpop.eup %2823  ;;  %v2746_v14 = vunpack.i.h.bf16 %v2744_v48  ;;  %v2745_v55 = vunpack.i.l.bf16 %v2744_v48 }
 0xb4f   :  { %v2073_v50 = vmax.f32 %v2070_v49, 1e-30  ;;  %2686 = vmatpush3.msra.mxu1 %v3448_v59  ;;  %v1399_v6 = vsub.f32 %v2824_v15, %v3413_v63 }
 0xb50   :  { %2687 = vmatprep.subr.mxu1 %v2998_v2  ;;  %2669 = vmatmul.mubr.msk.f32.gmra.mxu1 %vm1792_vm2, %v1830_v51  ;;  %v1516_v51 = vsel %vm1514_vm10, %v3552_v13, 0.0 }
 0xb51   :  { %2831 = vrcp.f32 %v2073_v50  ;;  %v2826_v56 = vpop.eup %2825  ;;  %2688 = vmatpush3.msra.mxu1 %v3435_v20  ;;  %v1478_v57 = vpop.permute.xlu1 %1477  ;;  %2671 = vmatprep.mubr.msk.f32.mxu1 %vm3703_vm15, %v2998_v2  ;;  %v2414_v12 = vadd.f32 -1.0, %v1399_v6  ;;  %v2260_v6 = vld [vmem:[%s3660_s16 + $0x10] sm:$0xff] }
 0xb52   :  { %v1476_v60 = vpop.permute.xlu0 %1475  ;;  %v1482_v59 = vadd.f32 %v2417_v16, %v1478_v57  ;;  %v1831_v11 = vmul.f32 %v2826_v56, %v3523_v53  ;;  %2709 = vmatprep.subr.mxu1 %v2998_v2  ;;  %v1515_v16 = vsel %vm1514_vm10, %v3555_v34, 0.0 }
 0xb53   :  { %v1481_v61 = vadd.f32 %v2416_v30, %v1476_v60  ;;  %v1517_v54 = vadd.f32 %v1516_v51, %v1515_v16 }
 0xb54   :  { %v1492_v62 = vmul.f32 %v2746_v14, %v1482_v59  ;;  %2672 = vmatmul.mubr.msk.f32.gmra.mxu1 %vm1792_vm2, %v1831_v11 }
 0xb55   :  { %v1491_v3 = vmul.f32 %v2745_v55, %v1481_v61  ;;  %v2828_v7 = vpop.eup %2827  ;;  %v2750_v20 = vpop.permute.xlu1 %2749  ;;  %2689 = vmatprep.mubr.msk.f32.mxu1 %vm3703_vm15, %v2998_v2  ;;  %v1518_v15 = vrot.slane %v1517_v54, 4 }
 0xb56   :  { %v1410_v26 = vpop.permute.xlu0 %1409  ;;  %v2077_v8 = vmul.f32 %v2828_v7, %v3529_v27  ;;  %v2752_v58 = vunpack.i.h.bf16 %v2750_v20  ;;  %1497 = vrot.lane.b32.xlu0 %v1492_v62, %s3002_s24  ;;  %v2751_v53 = vunpack.i.l.bf16 %v2750_v20  ;;  %v2259_v20 = vld [vmem:[%s3660_s16 + $0x8] sm:$0xff] }
 0xb57   :  { %v1414_v10 = vadd.f32 %v2415_v4, %v1410_v26  ;;  %1495 = vrot.lane.b32.xlu1 %v1491_v3, %s3002_s24  ;;  %v1519_v14 = vadd.f32 %v1518_v15, %v1517_v54  ;;  %v2261_v4 = vld [vmem:[%s3660_s16 + $0x18] sm:$0xff] }
 0xb58   :  { %2690 = vmatmul.mubr.msk.f32.vlgmr.msra.gmra.mxu1 %vm1792_vm2, %v2077_v8 }
 0xb59   :  { %v1426_v45 = vmul.f32 %v2752_v58, %v1414_v10  ;;  %v2830_v52 = vpop.eup %2829  ;;  %v1408_v63 = vpop.permute.xlu1 %1407  ;;  %2692 = vmatprep.mubr.msk.f32.mxu1 %vm3703_vm15, %v2998_v2  ;;  %v1520_v55 = vrot.slane %v1519_v14, 2  ;;  %2710 = vmatpush3.msra.mxu1 %v2261_v4 }
 0xb5a   :  { %v1413_v37 = vadd.f32 %v2414_v12, %v1408_v63  ;;  %v2078_v18 = vmul.f32 %v2830_v52, %v3535_v9  ;;  %v2175_v9 = vld [vmem:[#allocation12 + $0x10] sm:$0xff]  ;;  %2711 = vmatprep.subr.mxu1 %v2998_v2  ;;  %v2258_v12 = vld [vmem:[%s3660_s16] sm:$0xff] }
 0xb5b   :  { %1431 = vrot.lane.b32.xlu0 %v1426_v45, %s3002_s24  ;;  %2701 = vmatpush3.msra.mxu0 %v2175_v9  ;;  %v1521_v30 = vadd.f32 %v1520_v55, %v1519_v14 }
 0xb5c   :  { %v1425_v27 = vmul.f32 %v2751_v53, %v1413_v37  ;;  %2693 = vmatmul.mubr.msk.f32.gmra.mxu1 %vm1792_vm2, %v2078_v18  ;;  %2702 = vmatprep.subr.mxu0 %v2998_v2 }
 0xb5d   :  { %2695 = vmatprep.mubr.msk.f32.mxu1 %vm3703_vm15, %v2998_v2  ;;  %2703 = vmatpush3.msra.mxu0 %v2174_v21  ;;  %v1522_v56 = vrot.slane %v1521_v30, 1 }
 0xb5e   :  { %v2832_v17 = vpop.eup %2831  ;;  %1429 = vrot.lane.b32.xlu1 %v1425_v27, %s3002_s24  ;;  %2704 = vmatprep.subr.mxu0 %v2998_v2 }
 0xb5f   :  { %v2079_v19 = vmul.f32 %v2832_v17, %v3541_v5  ;;  %2705 = vmatpush3.msra.mxu0 %v2173_v24  ;;  %v1523_v57 = vadd.f32 %v1522_v56, %v1521_v30  ;;  %2712 = vmatpush3.msra.mxu1 %v2260_v6 }
 0xb60   :  { %2713 = vmatprep.subr.mxu1 %v2998_v2 }
 0xb61   :  { %2696 = vmatmul.mubr.msk.f32.gmra.mxu1 %vm1792_vm2, %v2079_v19  ;;  %vm3756_vm2 = vmmov %vm3755_vm14  ;;  %v1524_v60 = vmax.f32 %v1523_v57, 1.0 }
 0xb62   :  { %2717 = vmatprep.mubr.msk.f32.mxu1 %vm3703_vm15, %v2998_v2  ;;  %vm3757_vm15 = vmmov %vm3756_vm2  ;;  %2714 = vmatpush3.msra.mxu1 %v2259_v20 }
 0xb63   :  { %vm3758_vm11 = vmmov %vm3756_vm2  ;;  %2833 = vrcp.f32 %v1524_v60  ;;  %2715 = vmatprep.subr.mxu1 %v2998_v2 }
 0xb64   :  { %vm3759_vm8 = vmmov %vm3756_vm2  ;;  %2716 = vmatpush3.msra.mxu1 %v2258_v12 }
 0xb65   :  { %vm3760_vm1 = vmmov %vm3756_vm2 }
 0xb70   :  { %v2834_v10 = vpop.eup %2833 }
 0xbc8   :  { %v1498_v5 = vpop.permute.xlu0 %1497 }
 0xbc9   :  { %v1496_v25 = vpop.permute.xlu1 %1495  ;;  %v1504_v1 = vsel %vm3755_vm14, %v1498_v5, 0.0 }
 0xbca   :  { %v1501_v22 = vsel %vm3756_vm2, %v1496_v25, 0.0  ;;  %1505 = vadd.xlane.f32.xlu0 %v1504_v1 }
 0xbcb   :  { %1502 = vadd.xlane.f32.xlu1 %v1501_v22 }
 0xbcd   :  { %v1432_v31 = vpop.permute.xlu0 %1431 }
 0xbce   :  { %v1438_v32 = vsel %vm3758_vm11, %v1432_v31, 0.0 }
 0xbd0   :  { %v1430_v28 = vpop.permute.xlu1 %1429 }
 0xbd1   :  { %v1435_v29 = vsel %vm3757_vm15, %v1430_v28, 0.0 }
 0xbd2   :  { %1436 = vadd.xlane.f32.xlu0 %v1435_v29 }
 0xbd6   :  { %1439 = vadd.xlane.f32.xlu0 %v1438_v32 }
 0xc0c   :  { %v1907_v0 = vpop.f32.mrf.mxu1 }
 0xc0e   :  { %v2667_v33 = vpop.f32.mrf.mxu1 }
 0xc10   :  { %v1911_v35 = vpop.f32.mrf.mxu1 }
 0xc11   :  { %v2439_v35 = vld [vmem:[%s3659_s15] ss:$0 sm:$0xff] }
 0xc12   :  { %v2670_v36 = vpop.f32.mrf.mxu1 }
 0xc14   :  { %v1915_v38 = vpop.f32.mrf.mxu1 }
 0xc15   :  { %v2167_v48 = vmax.f32 %v1915_v38, 0.0 }
 0xc16   :  { %v2673_v39 = vpop.f32.mrf.mxu1 }
 0xc18   :  { %v2155_v40 = vpop.f32.mrf.mxu1 }
 0xc1a   :  { %v2691_v44 = vpop.f32.mrf.mxu1 }
 0xc1c   :  { %v2159_v41 = vpop.f32.mrf.mxu1 }
 0xc1e   :  { %v2694_v42 = vpop.f32.mrf.mxu1 }
 0xc21   :  { %v2163_v43 = vpop.f32.mrf.mxu1 }
 0xc22   :  { %v2168_v46 = vmax.f32 %v2163_v43, 0.0 }
 0xc23   :  { %v2697_v47 = vpop.f32.mrf.mxu1 }
 0xc24   :  { %v2170_v49 = vrot.slane %v2168_v46, 7 }
 0xc26   :  { %v2172_v50 = vsel %vm1538_vm6, %v2167_v48, %v2170_v49  ;;  %vm1448_vm6 = vcmask 7168  }
 0xc27   :  { %2707 = vmatmul.mubr.msk.f32.vlgmr.msra.gmra.mxu0 %vm3759_vm8, %v2172_v50  ;;  %v1450_v52 = vsel %vm1448_vm6, %v3552_v13, 0.0  ;;  %v1449_v63 = vsel %vm1448_vm6, %v3555_v34, 0.0 }
 0xc28   :  { %v1451_v37 = vadd.f32 %v1450_v52, %v1449_v63 }
 0xc2a   :  { %v1452_v18 = vrot.slane %v1451_v37, 4 }
 0xc2c   :  { %v1453_v2 = vadd.f32 %v1452_v18, %v1451_v37 }
 0xc2e   :  { %v1454_v17 = vrot.slane %v1453_v2, 2 }
 0xc30   :  { %v1455_v23 = vadd.f32 %v1454_v17, %v1453_v2 }
 0xc32   :  { %v1456_v21 = vrot.slane %v1455_v23, 1 }
 0xc34   :  { %v1457_v25 = vadd.f32 %v1456_v21, %v1455_v23 }
 0xc36   :  { %v1458_v22 = vmax.f32 %v1457_v25, 1.0 }
 0xc38   :  { %2835 = vrcp.f32 %v1458_v22 }
 0xc45   :  { %v2836_v34 = vpop.eup %2835 }
 0xc53   :  { %v1506_v59 = vpop.xlane.xlu0 %1505 }
 0xc54   :  { %v1503_v61 = vpop.xlane.xlu1 %1502 }
 0xc55   :  { %v1507_v11 = vadd.f32 %v1506_v59, %v1503_v61 }
 0xc57   :  { %v1508_v62 = vrot.slane %v1507_v11, 4 }
 0xc59   :  { %v1509_v3 = vadd.f32 %v1508_v62, %v1507_v11 }
 0xc5b   :  { %v1510_v7 = vrot.slane %v1509_v3, 2  ;;  %v1437_v27 = vpop.xlane.xlu0 %1436 }
 0xc5d   :  { %v1511_v26 = vadd.f32 %v1510_v7, %v1509_v3 }
 0xc5f   :  { %v1512_v8 = vrot.slane %v1511_v26, 1  ;;  %v1440_v19 = vpop.xlane.xlu0 %1439 }
 0xc60   :  { %v1441_v9 = vadd.f32 %v1440_v19, %v1437_v27 }
 0xc61   :  { %v1513_v58 = vadd.f32 %v1512_v8, %v1511_v26 }
 0xc62   :  { %v1442_v24 = vrot.slane %v1441_v9, 4 }
 0xc63   :  { %v1526_v53 = vmul.f32 0.5, %v1513_v58 }
 0xc64   :  { %v1443_v5 = vadd.f32 %v1442_v24, %v1441_v9 }
 0xc65   :  { %v1527_v45 = vmul.f32 %v2834_v10, %v1526_v53 }
 0xc66   :  { %v1444_v1 = vrot.slane %v1443_v5, 2 }
 0xc67   :  { %1529 = vrot.lane.b32.xlu1 %v1527_v45, %s3003_s4 }
 0xc68   :  { %v1445_v28 = vadd.f32 %v1444_v1, %v1443_v5 }
 0xc6a   :  { %v1446_v29 = vrot.slane %v1445_v28, 1 }
 0xc6c   :  { %v1447_v13 = vadd.f32 %v1446_v29, %v1445_v28 }
 0xc6e   :  { %v1460_v31 = vmul.f32 0.5, %v1447_v13 }
 0xc70   :  { %v1461_v32 = vmul.f32 %v2836_v34, %v1460_v31 }
 0xcd9   :  { %v1530_v0 = vpop.permute.xlu1 %1529 }
 0xcda   :  { %v1532_v33 = vadd.f32 %v1530_v0, %v1461_v32 }
 0xcdc   :  { %1534 = vst.msk [vmem:[#allocation14] sm:$0x1] %vm1533_vm13, %v1532_v33 }
 0xce7   :  { %v2253_v36 = vpop.f32.mrf.mxu0 }
 0xce8   :  { %v2254_v38 = vadd.f32 %v2439_v35, %v2253_v36 }
 0xce9   :  { %v2708_v39 = vpop.f32.mrf.mxu0 }
 0xcea   :  { %v2257_v40 = vmax.f32 %v2254_v38, 0.0 }
 0xcec   :  { %2718 = vmatmul.mubr.msk.f32.vlgmr.msra.gmra.mxu1 %vm3760_vm1, %v2257_v40 }
 0xced   :  { %2970 = shalt.err (!%p2967_p6)
}
 0xcee   :  { %2355 = dma.vmem_to_hbm [thread:$0]  %s2353_s14, 16, %s3663_s19, [#allocation5]   ;;  %v2441_v44 = vld [vmem:[#allocation2] ss:$0 sm:$0xff]  ;;  %vm2342_vm5 = vcmask 1024  }
 0xdac   :  { %v2338_v41 = vpop.f32.mrf.mxu1 }
 0xdad   :  { %v2339_v42 = vadd.f32 %v2441_v44, %v2338_v41 }
 0xdae   :  { %v2719_v43 = vpop.f32.mrf.mxu1 }
 0xdaf   :  { %2343 = vst.msk [vmem:[%s3662_s18] sm:$0x3] %vm2342_vm5, %v2339_v42 }
 0xdb0   :  { %2987 = dma.done.wait [#allocation5], 16  }
 0xdb1   :  { %2988 = vsyncadd [#allocation5], 4294967280 }
 0xdb2   :  { %2361 = vsyncpa [#allocation4], 1 }
 0xdb3   :  { %2362 = vsyncpa [#allocation7], 1 }
 0xdb4   :  { %2363 = vsyncpa [#allocation10], 1 }
 0xdb5   :  { %2364 = vsyncpa [#allocation13], 1 }
 0xdb6   :  { %2365 = vsyncpa [#allocation5], 1 }

</bundles_post_ra>
